<compile_context>
chip_gen: v7x
topology: tpu7x:2x2x1
jax: 0.10.0
libtpu: 0.0.40
codegen_flags: <defaults>
</compile_context>

<pallas_src>
import jax
import jax.numpy as jnp
import numpy as np
from jax.experimental import pallas as pl
from jax.experimental.pallas import tpu as pltpu

_NEG_INF = -1e30


# ----------------------------- Pallas kernel ------------------------------ #
def _make_kernel(n_rows: int, tile_n: int, h2: int, has_tail: bool):
    def kernel(h_ref, w1_ref, b1_ref,
               wab_ref, bab_ref,
               wc_ref, bc_ref, wcls_ref, bcls_ref,
               yprob_ref,
               m_ref, l_ref, acc_ref):
        i = pl.program_id(0)

        @pl.when(i == 0)
        def _init():
            m_ref[...] = jnp.full_like(m_ref, _NEG_INF)
            l_ref[...] = jnp.zeros_like(l_ref)
            acc_ref[...] = jnp.zeros_like(acc_ref)

        h = h_ref[...]                                          # bf16 [T, F]

        # fc: Linear(F, H1) + ReLU  -- bf16 operands, f32 accumulation on the MXU
        h1 = jnp.dot(h, w1_ref[...],
                     preferred_element_type=jnp.float32) + b1_ref[...]
        h1 = jnp.maximum(h1, 0.0)                               # [T, H1] f32
        h1b = h1.astype(jnp.bfloat16)

        # Gated attention net: fused wa|wb -> single [T, 2*H2]-output MXU matmul
        ab = jnp.dot(h1b, wab_ref[...],
                     preferred_element_type=jnp.float32) + bab_ref[...]
        a = jnp.tanh(ab[:, :h2])                                # [T, H2] f32
        b = jax.nn.sigmoid(ab[:, h2:])                          # [T, H2] f32

        # attention score via VPU multiply + lane reduction (wc presented as [1, H2]
        # row) instead of a degenerate [T,H2]@[H2,1] MXU matmul.
        att = jnp.sum((a * b) * wc_ref[...], axis=-1, keepdims=True) + bc_ref[...]

        if has_tail:
            # cheap [T,1] mask; padded (zero) rows of h are excluded from the softmax
            row = i * tile_n + jax.lax.broadcasted_iota(jnp.int32, (tile_n, 1), 0)
            att = jnp.where(row < n_rows, att, _NEG_INF)

        # ---- online softmax over the N instances ----
        m_prev = m_ref[...]                                     # [1,1]
        m_new = jnp.maximum(m_prev, jnp.max(att, axis=0, keepdims=True))
        scale = jnp.exp(m_prev - m_new)                         # [1,1]
        p = jnp.exp(att - m_new)                                # [T,1]; masked rows -> 0
        l_ref[...] = l_ref[...] * scale + jnp.sum(p, axis=0, keepdims=True)

        # p^T @ h1 on the MXU ([1,T] x [T,H1]) instead of VPU multiply + XLU reduce
        pw = jax.lax.dot_general(p.astype(jnp.bfloat16), h1b,
                                 (((0,), (0,)), ((), ())),
                                 preferred_element_type=jnp.float32)   # [1, H1]
        acc_ref[...] = acc_ref[...] * scale + pw
        m_ref[...] = m_new

        # ---- finalize: M, classifier, Y_prob (runs once, on the last tile) ----
        @pl.when(i == pl.num_programs(0) - 1)
        def _finalize():
            M = acc_ref[...] / l_ref[...]                       # exact divide; runs once
            logits = jnp.dot(M, wcls_ref[...],
                             preferred_element_type=jnp.float32) + bcls_ref[...]
            logits = logits - jnp.max(logits, axis=1, keepdims=True)
            e = jnp.exp(logits)
            yprob_ref[...] = e / jnp.sum(e, axis=1, keepdims=True)

    return kernel


# ------------------------------ host wrapper ------------------------------ #
def mil_attention_fc_forward(h, params, *, tile_n=512):
    """h: [N, F] float32. params: weights stored as [in, out], biases as [1, dim] rows.

    tile_n ~ 256-1024; larger tiles spill f32 intermediates to VMEM, so keep modest.
    """
    N, F = h.shape
    H1 = params["w1"].shape[1]
    H2 = params["wa"].shape[1]
    C = params["wcls"].shape[1]

    def round_up(x, m):
        return ((x + m - 1) // m) * m

    # effective tile: whole (rounded-up) bag if it fits, else a multiple of 16 rows
    if tile_n >= N:
        tile_n = round_up(N, 16)
    else:
        tile_n = max(16, (tile_n // 16) * 16)
    n_tiles = pl.cdiv(N, tile_n)
    n_pad = n_tiles * tile_n
    has_tail = n_pad != N

    # bf16 streamed features (halves DMA bytes); zero-pad rows to a tile multiple so
    # no per-tile [T,F]/[T,H1] masking is needed (padded rows masked via att=-inf).
    h_bf16 = h.astype(jnp.bfloat16)
    if has_tail:
        h_bf16 = jnp.pad(h_bf16, ((0, n_pad - N), (0, 0)))

    # bf16 weight operands for the MXU (f32 accumulation in-kernel); tiny one-time cast.
    w1 = params["w1"].astype(jnp.bfloat16)
    wab = jnp.concatenate([params["wa"], params["wb"]], axis=1).astype(jnp.bfloat16)
    bab = jnp.concatenate([params["ba"], params["bb"]], axis=1).astype(jnp.float32)
    wc_row = params["wc"].reshape(1, H2).astype(jnp.float32)    # [1, H2] row for VPU reduce

    args = (h_bf16, w1, params["b1"], wab, bab,
            wc_row, params["bc"], params["wcls"], params["bcls"])

    def resident(shape):  # weights/biases: same block every grid step -> stays in VMEM
        return pl.BlockSpec(shape, lambda i: (0, 0))

    grid_spec = pltpu.PrefetchScalarGridSpec(
        num_scalar_prefetch=0,
        grid=(n_tiles,),
        in_specs=[
            pl.BlockSpec((tile_n, F), lambda i: (i, 0)),   # h: streamed, double-buffered
            resident((F, H1)),      resident((1, H1)),     # w1, b1
            resident((H1, 2 * H2)), resident((1, 2 * H2)), # wa|wb, ba|bb
            resident((1, H2)),      resident((1, 1)),      # wc_row, bc
            resident((H1, C)),      resident((1, C)),      # wcls, bcls
        ],
        out_specs=pl.BlockSpec((1, C), lambda i: (0, 0)),
        scratch_shapes=[
            pltpu.VMEM((1, 1), jnp.float32),    # running max  m
            pltpu.VMEM((1, 1), jnp.float32),    # running sum  l
            pltpu.VMEM((1, H1), jnp.float32),   # running weighted sum of h1
        ],
    )

    # Scheduler hint so XLA overlaps the kernel with the host-side casts/pads.
    flops = int(2 * n_pad * F * H1 + 2 * n_pad * H1 * (2 * H2)
                + 4 * n_pad * H2 + 2 * n_pad * H1 + 2 * H1 * C)
    transcendentals = int(n_pad * (2 * H2 + 2))
    bytes_accessed = int(n_pad * F * 2                      # streamed bf16 h
                         + 2 * (F * H1 + H1 * 2 * H2)       # bf16 weights
                         + 4 * (H1 + 2 * H2 + H2 + 1 + H1 * C + C)
                         + 4 * C)                           # output
    cost = pl.CostEstimate(flops=flops, transcendentals=transcendentals,
                           bytes_accessed=bytes_accessed)

    return pl.pallas_call(
        _make_kernel(N, tile_n, H2, has_tail),
        out_shape=jax.ShapeDtypeStruct((1, C), jnp.float32),
        grid_spec=grid_spec,
        compiler_params=pltpu.CompilerParams(
            dimension_semantics=("arbitrary",),      # N axis is a reduction
            vmem_limit_bytes=32 * 1024 * 1024,
        ),
        cost_estimate=cost,
    )(*args)


# --------------------------- parameter creation ---------------------------- #
def xavier_normal(key, fan_in, fan_out):
    std = float(np.sqrt(2.0 / (fan_in + fan_out)))
    # stored as [in, out] (transposed relative to PyTorch's [out, in])
    return std * jax.random.normal(key, (fan_in, fan_out), dtype=jnp.float32)


def init_params(key, feats_size=512, n_classes=2, size_arg="small"):
    size_dict = {"small": [feats_size, 256, 128], "big": [feats_size, 384, 256]}
    F, H1, H2 = size_dict[size_arg]
    ks = jax.random.split(key, 5)
    return {
        "w1":   xavier_normal(ks[0], F, H1),  "b1":   jnp.zeros((1, H1), jnp.float32),
        "wa":   xavier_normal(ks[1], H1, H2), "ba":   jnp.zeros((1, H2), jnp.float32),
        "wb":   xavier_normal(ks[2], H1, H2), "bb":   jnp.zeros((1, H2), jnp.float32),
        "wc":   xavier_normal(ks[3], H2, 1),  "bc":   jnp.zeros((1, 1), jnp.float32),
        "wcls": xavier_normal(ks[4], H1, n_classes),
        "bcls": jnp.zeros((1, n_classes), jnp.float32),
    }


# ----------------------------- pure-JAX reference -------------------------- #
def reference_forward(h, p):
    h1 = jnp.maximum(h @ p["w1"] + p["b1"], 0.0)
    a = jnp.tanh(h1 @ p["wa"] + p["ba"])
    b = jax.nn.sigmoid(h1 @ p["wb"] + p["bb"])
    A = (a * b) @ p["wc"] + p["bc"]                  # [N, 1]
    A = jax.nn.softmax(A.T, axis=1)                  # [1, N]
    M = A @ h1                                       # [1, H1]
    logits = M @ p["wcls"] + p["bcls"]
    return jax.nn.softmax(logits, axis=1)


if __name__ == "__main__":
    key = jax.random.PRNGKey(0)
    k_param, k_data = jax.random.split(key)

    # small MIL bag; N deliberately not a multiple of the tile to exercise the tail path
    N, feats_size, n_classes = 300, 512, 2
    params = init_params(k_param, feats_size=feats_size, n_classes=n_classes)
    h = jax.random.normal(k_data, (N, feats_size), dtype=jnp.float32)

    y_prob = mil_attention_fc_forward(h, params, tile_n=128)
    y_prob = jax.block_until_ready(y_prob)

    y_ref = reference_forward(h, params)
    # bf16 streamed features / matmul operands -> loosened tolerance vs f32 reference
    np.testing.assert_allclose(np.asarray(y_prob), np.asarray(y_ref),
                               rtol=3e-2, atol=3e-2)
    print("KERNEL_OK")
</pallas_src>

<mosaic_0001>
module attributes {stable_mosaic.version = 11 : i64} {
  func.func @kernel(%arg0: i32, %arg1: memref<128x512xbf16, #tpu.memory_space<vmem>>, %arg2: memref<512x256xbf16, #tpu.memory_space<vmem>>, %arg3: memref<1x256xf32, #tpu.memory_space<vmem>>, %arg4: memref<256x256xbf16, #tpu.memory_space<vmem>>, %arg5: memref<1x256xf32, #tpu.memory_space<vmem>>, %arg6: memref<1x128xf32, #tpu.memory_space<vmem>>, %arg7: memref<1x1xf32, #tpu.memory_space<vmem>>, %arg8: memref<256x2xf32, #tpu.memory_space<vmem>>, %arg9: memref<1x2xf32, #tpu.memory_space<vmem>>, %arg10: memref<1x2xf32, #tpu.memory_space<vmem>>, %arg11: memref<1x1xf32, #tpu.memory_space<vmem>>, %arg12: memref<1x1xf32, #tpu.memory_space<vmem>>, %arg13: memref<1x256xf32, #tpu.memory_space<vmem>>) attributes {dimension_semantics = [#tpu.dimension_semantics<arbitrary>], iteration_bounds = array<i64: 3>, scalar_prefetch = 0 : i64, scratch_operands = 3 : i64, tpu.core_type = #tpu.core_type<tc>, window_params = [{transform_indices = @transform_0, window_bounds = array<i64: 128, 512>}, {pipeline_mode = #tpu.pipeline_mode<synchronous>, transform_indices = @transform_1, window_bounds = array<i64: 512, 256>}, {pipeline_mode = #tpu.pipeline_mode<synchronous>, transform_indices = @transform_2, window_bounds = array<i64: 1, 256>}, {pipeline_mode = #tpu.pipeline_mode<synchronous>, transform_indices = @transform_3, window_bounds = array<i64: 256, 256>}, {pipeline_mode = #tpu.pipeline_mode<synchronous>, transform_indices = @transform_4, window_bounds = array<i64: 1, 256>}, {pipeline_mode = #tpu.pipeline_mode<synchronous>, transform_indices = @transform_5, window_bounds = array<i64: 1, 128>}, {pipeline_mode = #tpu.pipeline_mode<synchronous>, transform_indices = @transform_6, window_bounds = array<i64: 1, 1>}, {pipeline_mode = #tpu.pipeline_mode<synchronous>, transform_indices = @transform_7, window_bounds = array<i64: 256, 2>}, {pipeline_mode = #tpu.pipeline_mode<synchronous>, transform_indices = @transform_8, window_bounds = array<i64: 1, 2>}, {pipeline_mode = #tpu.pipeline_mode<synchronous>, transform_indices = @transform_9, window_bounds = array<i64: 1, 2>}]} {
    %c0_i32 = arith.constant 0 : i32
    %0 = arith.cmpi eq, %arg0, %c0_i32 : i32
    %1 = arith.extui %0 : i1 to i32
    %c0_i32_0 = arith.constant 0 : i32
    %2 = arith.cmpi ne, %1, %c0_i32_0 : i32
    scf.if %2 {
      %cst_35 = arith.constant -1.000000e+30 : f32
      %68 = vector.broadcast %cst_35 : f32 to vector<1x1xf32>
      %c0_36 = arith.constant 0 : index
      %c0_37 = arith.constant 0 : index
      %69 = vector.load %arg11[%c0_36, %c0_37] : memref<1x1xf32, #tpu.memory_space<vmem>>, vector<1x1xf32>
      tpu.vector_store %arg11[%c0_36, %c0_37], %68 {strides = array<i32>} : memref<1x1xf32, #tpu.memory_space<vmem>>, vector<1x1xf32>,
      %cst_38 = arith.constant 0.000000e+00 : f32
      %70 = vector.broadcast %cst_38 : f32 to vector<1x1xf32>
      %c0_39 = arith.constant 0 : index
      %c0_40 = arith.constant 0 : index
      %71 = vector.load %arg12[%c0_39, %c0_40] : memref<1x1xf32, #tpu.memory_space<vmem>>, vector<1x1xf32>
      tpu.vector_store %arg12[%c0_39, %c0_40], %70 {strides = array<i32>} : memref<1x1xf32, #tpu.memory_space<vmem>>, vector<1x1xf32>,
      %cst_41 = arith.constant 0.000000e+00 : f32
      %72 = vector.broadcast %cst_41 : f32 to vector<1x256xf32>
      %c0_42 = arith.constant 0 : index
      %c0_43 = arith.constant 0 : index
      %73 = vector.load %arg13[%c0_42, %c0_43] : memref<1x256xf32, #tpu.memory_space<vmem>>, vector<1x256xf32>
      tpu.vector_store %arg13[%c0_42, %c0_43], %72 {strides = array<i32>} : memref<1x256xf32, #tpu.memory_space<vmem>>, vector<1x256xf32>,
    } else {
    }
    %c0 = arith.constant 0 : index
    %c0_1 = arith.constant 0 : index
    %3 = vector.load %arg1[%c0, %c0_1] : memref<128x512xbf16, #tpu.memory_space<vmem>>, vector<128x512xbf16>
    %c0_2 = arith.constant 0 : index
    %c0_3 = arith.constant 0 : index
    %4 = vector.load %arg2[%c0_2, %c0_3] : memref<512x256xbf16, #tpu.memory_space<vmem>>, vector<512x256xbf16>
    %cst = arith.constant dense<0.000000e+00> : vector<128x256xf32>
    %5 = tpu.matmul %3, %4, %cst {dimension_numbers = #tpu.dot_dimension_numbers<[1], [0], [0], [1], [0, 0, 1, 1], [], []>} : vector<128x512xbf16>, vector<512x256xbf16>, vector<128x256xf32> -> vector<128x256xf32>
    %c0_4 = arith.constant 0 : index
    %c0_5 = arith.constant 0 : index
    %6 = vector.load %arg3[%c0_4, %c0_5] : memref<1x256xf32, #tpu.memory_space<vmem>>, vector<1x256xf32>
    %7 = vector.broadcast %6 : vector<1x256xf32> to vector<128x256xf32>
    %8 = arith.addf %5, %7 : vector<128x256xf32>
    %cst_6 = arith.constant 0.000000e+00 : f32
    %9 = vector.broadcast %cst_6 : f32 to vector<128x256xf32>
    %10 = arith.maximumf %8, %9 : vector<128x256xf32>
    %11 = arith.truncf %10 : vector<128x256xf32> to vector<128x256xbf16>
    %c0_7 = arith.constant 0 : index
    %c0_8 = arith.constant 0 : index
    %12 = vector.load %arg4[%c0_7, %c0_8] : memref<256x256xbf16, #tpu.memory_space<vmem>>, vector<256x256xbf16>
    %cst_9 = arith.constant dense<0.000000e+00> : vector<128x256xf32>
    %13 = tpu.matmul %11, %12, %cst_9 {dimension_numbers = #tpu.dot_dimension_numbers<[1], [0], [0], [1], [0, 0, 1, 1], [], []>} : vector<128x256xbf16>, vector<256x256xbf16>, vector<128x256xf32> -> vector<128x256xf32>
    %c0_10 = arith.constant 0 : index
    %c0_11 = arith.constant 0 : index
    %14 = vector.load %arg5[%c0_10, %c0_11] : memref<1x256xf32, #tpu.memory_space<vmem>>, vector<1x256xf32>
    %15 = vector.broadcast %14 : vector<1x256xf32> to vector<128x256xf32>
    %16 = arith.addf %13, %15 : vector<128x256xf32>
    %17 = vector.extract_strided_slice %16 {offsets = [0, 0], sizes = [128, 128], strides = [1, 1]} : vector<128x256xf32> to vector<128x128xf32>
    %18 = math.tanh %17 : vector<128x128xf32>
    %19 = vector.extract_strided_slice %16 {offsets = [0, 128], sizes = [128, 128], strides = [1, 1]} : vector<128x256xf32> to vector<128x128xf32>
    %20 = arith.negf %19 : vector<128x128xf32>
    %21 = math.exp %20 : vector<128x128xf32>
    %cst_12 = arith.constant 1.000000e+00 : f32
    %22 = vector.broadcast %cst_12 : f32 to vector<128x128xf32>
    %23 = arith.addf %22, %21 : vector<128x128xf32>
    %24 = arith.divf %22, %23 : vector<128x128xf32>
    %25 = arith.mulf %18, %24 : vector<128x128xf32>
    %c0_13 = arith.constant 0 : index
    %c0_14 = arith.constant 0 : index
    %26 = vector.load %arg6[%c0_13, %c0_14] : memref<1x128xf32, #tpu.memory_space<vmem>>, vector<1x128xf32>
    %27 = vector.broadcast %26 : vector<1x128xf32> to vector<128x128xf32>
    %28 = arith.mulf %25, %27 : vector<128x128xf32>
    %cst_15 = arith.constant dense<0.000000e+00> : vector<128xf32>
    %29 = vector.multi_reduction <add>, %28, %cst_15 [1] : vector<128x128xf32> to vector<128xf32>
    %30 = vector.shape_cast %29 : vector<128xf32> to vector<128x1xf32>
    %c0_16 = arith.constant 0 : index
    %c0_17 = arith.constant 0 : index
    %31 = vector.load %arg7[%c0_16, %c0_17] : memref<1x1xf32, #tpu.memory_space<vmem>>, vector<1x1xf32>
    %32 = vector.broadcast %31 : vector<1x1xf32> to vector<128x1xf32>
    %33 = arith.addf %30, %32 : vector<128x1xf32>
    %c128_i32 = arith.constant 128 : i32
    %34 = arith.muli %arg0, %c128_i32 : i32
    %35 = tpu.iota {dimensions = array<i32: 0>} : vector<128x1xi32>
    %36 = vector.broadcast %34 : i32 to vector<128x1xi32>
    %37 = arith.addi %36, %35 : vector<128x1xi32>
    %c300_i32 = arith.constant 300 : i32
    %38 = vector.broadcast %c300_i32 : i32 to vector<128x1xi32>
    %39 = arith.cmpi slt, %37, %38 : vector<128x1xi32>
    %cst_18 = arith.constant -1.000000e+30 : f32
    %40 = vector.broadcast %cst_18 : f32 to vector<128x1xf32>
    %41 = arith.select %39, %33, %40 : vector<128x1xi1>, vector<128x1xf32>
    %c0_19 = arith.constant 0 : index
    %c0_20 = arith.constant 0 : index
    %42 = vector.load %arg11[%c0_19, %c0_20] : memref<1x1xf32, #tpu.memory_space<vmem>>, vector<1x1xf32>
    %cst_21 = arith.constant dense<0xFF800000> : vector<1xf32>
    %43 = vector.multi_reduction <maximumf>, %41, %cst_21 [0] : vector<128x1xf32> to vector<1xf32>
    %44 = vector.shape_cast %43 : vector<1xf32> to vector<1x1xf32>
    %45 = arith.maximumf %42, %44 : vector<1x1xf32>
    %46 = arith.subf %42, %45 : vector<1x1xf32>
    %47 = math.exp %46 : vector<1x1xf32>
    %48 = vector.broadcast %45 : vector<1x1xf32> to vector<128x1xf32>
    %49 = arith.subf %41, %48 : vector<128x1xf32>
    %50 = math.exp %49 : vector<128x1xf32>
    %c0_22 = arith.constant 0 : index
    %c0_23 = arith.constant 0 : index
    %51 = vector.load %arg12[%c0_22, %c0_23] : memref<1x1xf32, #tpu.memory_space<vmem>>, vector<1x1xf32>
    %52 = arith.mulf %51, %47 : vector<1x1xf32>
    %cst_24 = arith.constant dense<0.000000e+00> : vector<1xf32>
    %53 = vector.multi_reduction <add>, %50, %cst_24 [0] : vector<128x1xf32> to vector<1xf32>
    %54 = vector.shape_cast %53 : vector<1xf32> to vector<1x1xf32>
    %55 = arith.addf %52, %54 : vector<1x1xf32>
    %c0_25 = arith.constant 0 : index
    %c0_26 = arith.constant 0 : index
    %56 = vector.load %arg12[%c0_25, %c0_26] : memref<1x1xf32, #tpu.memory_space<vmem>>, vector<1x1xf32>
    tpu.vector_store %arg12[%c0_25, %c0_26], %55 {strides = array<i32>} : memref<1x1xf32, #tpu.memory_space<vmem>>, vector<1x1xf32>,
    %57 = arith.truncf %50 : vector<128x1xf32> to vector<128x1xbf16>
    %cst_27 = arith.constant dense<0.000000e+00> : vector<1x256xf32>
    %58 = tpu.matmul %57, %11, %cst_27 {dimension_numbers = #tpu.dot_dimension_numbers<[0], [0], [1], [1], [0, 1, 1, 1], [], []>} : vector<128x1xbf16>, vector<128x256xbf16>, vector<1x256xf32> -> vector<1x256xf32>
    %c0_28 = arith.constant 0 : index
    %c0_29 = arith.constant 0 : index
    %59 = vector.load %arg13[%c0_28, %c0_29] : memref<1x256xf32, #tpu.memory_space<vmem>>, vector<1x256xf32>
    %60 = vector.broadcast %47 : vector<1x1xf32> to vector<1x256xf32>
    %61 = arith.mulf %59, %60 : vector<1x256xf32>
    %62 = arith.addf %61, %58 : vector<1x256xf32>
    %c0_30 = arith.constant 0 : index
    %c0_31 = arith.constant 0 : index
    %63 = vector.load %arg13[%c0_30, %c0_31] : memref<1x256xf32, #tpu.memory_space<vmem>>, vector<1x256xf32>
    tpu.vector_store %arg13[%c0_30, %c0_31], %62 {strides = array<i32>} : memref<1x256xf32, #tpu.memory_space<vmem>>, vector<1x256xf32>,
    %c0_32 = arith.constant 0 : index
    %c0_33 = arith.constant 0 : index
    %64 = vector.load %arg11[%c0_32, %c0_33] : memref<1x1xf32, #tpu.memory_space<vmem>>, vector<1x1xf32>
    tpu.vector_store %arg11[%c0_32, %c0_33], %45 {strides = array<i32>} : memref<1x1xf32, #tpu.memory_space<vmem>>, vector<1x1xf32>,
    %c2_i32 = arith.constant 2 : i32
    %65 = arith.cmpi eq, %arg0, %c2_i32 : i32
    %66 = arith.extui %65 : i1 to i32
    %c0_i32_34 = arith.constant 0 : i32
    %67 = arith.cmpi ne, %66, %c0_i32_34 : i32
    scf.if %67 {
      %c0_35 = arith.constant 0 : index
      %c0_36 = arith.constant 0 : index
      %68 = vector.load %arg13[%c0_35, %c0_36] : memref<1x256xf32, #tpu.memory_space<vmem>>, vector<1x256xf32>
      %c0_37 = arith.constant 0 : index
      %c0_38 = arith.constant 0 : index
      %69 = vector.load %arg12[%c0_37, %c0_38] : memref<1x1xf32, #tpu.memory_space<vmem>>, vector<1x1xf32>
      %70 = vector.broadcast %69 : vector<1x1xf32> to vector<1x256xf32>
      %71 = arith.divf %68, %70 : vector<1x256xf32>
      %c0_39 = arith.constant 0 : index
      %c0_40 = arith.constant 0 : index
      %72 = vector.load %arg8[%c0_39, %c0_40] : memref<256x2xf32, #tpu.memory_space<vmem>>, vector<256x2xf32>
      %cst_41 = arith.constant dense<0.000000e+00> : vector<1x2xf32>
      %73 = tpu.matmul %71, %72, %cst_41 {dimension_numbers = #tpu.dot_dimension_numbers<[1], [0], [0], [1], [0, 0, 1, 1], [], []>} : vector<1x256xf32>, vector<256x2xf32>, vector<1x2xf32> -> vector<1x2xf32>
      %c0_42 = arith.constant 0 : index
      %c0_43 = arith.constant 0 : index
      %74 = vector.load %arg9[%c0_42, %c0_43] : memref<1x2xf32, #tpu.memory_space<vmem>>, vector<1x2xf32>
      %75 = arith.addf %73, %74 : vector<1x2xf32>
      %cst_44 = arith.constant dense<0xFF800000> : vector<1xf32>
      %76 = vector.multi_reduction <maximumf>, %75, %cst_44 [1] : vector<1x2xf32> to vector<1xf32>
      %77 = vector.shape_cast %76 : vector<1xf32> to vector<1x1xf32>
      %78 = vector.broadcast %77 : vector<1x1xf32> to vector<1x2xf32>
      %79 = arith.subf %75, %78 : vector<1x2xf32>
      %80 = math.exp %79 : vector<1x2xf32>
      %cst_45 = arith.constant dense<0.000000e+00> : vector<1xf32>
      %81 = vector.multi_reduction <add>, %80, %cst_45 [1] : vector<1x2xf32> to vector<1xf32>
      %82 = vector.shape_cast %81 : vector<1xf32> to vector<1x1xf32>
      %83 = vector.broadcast %82 : vector<1x1xf32> to vector<1x2xf32>
      %84 = arith.divf %80, %83 : vector<1x2xf32>
      %c0_46 = arith.constant 0 : index
      %c0_47 = arith.constant 0 : index
      %85 = vector.load %arg10[%c0_46, %c0_47] : memref<1x2xf32, #tpu.memory_space<vmem>>, vector<1x2xf32>
      tpu.vector_store %arg10[%c0_46, %c0_47], %84 {strides = array<i32>} : memref<1x2xf32, #tpu.memory_space<vmem>>, vector<1x2xf32>,
    } else {
    }
    return
  }
  func.func @transform_0(%arg0: i32) -> (i32, i32) {
    %c0_i32 = arith.constant 0 : i32
    %c0_i32_0 = arith.constant 0 : i32
    return %arg0, %c0_i32 : i32, i32
  }
  func.func @transform_1(%arg0: i32) -> (i32, i32) {
    %c0_i32 = arith.constant 0 : i32
    %c0_i32_0 = arith.constant 0 : i32
    %c0_i32_1 = arith.constant 0 : i32
    return %c0_i32, %c0_i32_0 : i32, i32
  }
  func.func @transform_2(%arg0: i32) -> (i32, i32) {
    %c0_i32 = arith.constant 0 : i32
    %c0_i32_0 = arith.constant 0 : i32
    %c0_i32_1 = arith.constant 0 : i32
    return %c0_i32, %c0_i32_0 : i32, i32
  }
  func.func @transform_3(%arg0: i32) -> (i32, i32) {
    %c0_i32 = arith.constant 0 : i32
    %c0_i32_0 = arith.constant 0 : i32
    %c0_i32_1 = arith.constant 0 : i32
    return %c0_i32, %c0_i32_0 : i32, i32
  }
  func.func @transform_4(%arg0: i32) -> (i32, i32) {
    %c0_i32 = arith.constant 0 : i32
    %c0_i32_0 = arith.constant 0 : i32
    %c0_i32_1 = arith.constant 0 : i32
    return %c0_i32, %c0_i32_0 : i32, i32
  }
  func.func @transform_5(%arg0: i32) -> (i32, i32) {
    %c0_i32 = arith.constant 0 : i32
    %c0_i32_0 = arith.constant 0 : i32
    %c0_i32_1 = arith.constant 0 : i32
    return %c0_i32, %c0_i32_0 : i32, i32
  }
  func.func @transform_6(%arg0: i32) -> (i32, i32) {
    %c0_i32 = arith.constant 0 : i32
    %c0_i32_0 = arith.constant 0 : i32
    %c0_i32_1 = arith.constant 0 : i32
    return %c0_i32, %c0_i32_0 : i32, i32
  }
  func.func @transform_7(%arg0: i32) -> (i32, i32) {
    %c0_i32 = arith.constant 0 : i32
    %c0_i32_0 = arith.constant 0 : i32
    %c0_i32_1 = arith.constant 0 : i32
    return %c0_i32, %c0_i32_0 : i32, i32
  }
  func.func @transform_8(%arg0: i32) -> (i32, i32) {
    %c0_i32 = arith.constant 0 : i32
    %c0_i32_0 = arith.constant 0 : i32
    %c0_i32_1 = arith.constant 0 : i32
    return %c0_i32, %c0_i32_0 : i32, i32
  }
  func.func @transform_9(%arg0: i32) -> (i32, i32) {
    %c0_i32 = arith.constant 0 : i32
    %c0_i32_0 = arith.constant 0 : i32
    %c0_i32_1 = arith.constant 0 : i32
    return %c0_i32, %c0_i32_0 : i32, i32
  }
}

</mosaic_0001>

<bundles_post_ra>
// kernel: tpu_custom_call.1
= control target key start
LH: loop header
LB: loop body
LE: loop exit
PB: predicated region body
PF: predicated region fallthrough
CT: control target
= control target key end

     0   :  { %s3855_s0 = inlined_call_operand.hbm [shape: bf16[384,512], index: 0, kind: input, shape index: {}]   ;;  %s3856_s1 = inlined_call_operand.hbm [shape: bf16[512,256], index: 1, kind: input, shape index: {}]   ;;  %s3857_s2 = inlined_call_operand.vmem [shape: f32[1,256], index: 2, kind: input, shape index: {}]   ;;  %s3858_s3 = inlined_call_operand.vmem [shape: bf16[256,256], index: 3, kind: input, shape index: {}]   ;;  %s3859_s4 = inlined_call_operand.vmem [shape: f32[1,256], index: 4, kind: input, shape index: {}]   ;;  %s3860_s5 = inlined_call_operand.vmem [shape: f32[1,128], index: 5, kind: input, shape index: {}]   ;;  %s3861_s6 = inlined_call_operand.<no memory space> [shape: f32[1,1], index: 6, kind: input, shape index: {}]   ;;  %s3862_s7 = inlined_call_operand.vmem [shape: f32[256,2], index: 7, kind: input, shape index: {}]   ;;  %s3863_s8 = inlined_call_operand.vmem [shape: f32[1,2], index: 8, kind: input, shape index: {}]   ;;  %s3864_s9 = inlined_call_operand.hbm [shape: f32[1,2], index: 9, kind: output, shape index: {}]  }
   0x1   :  { %v14_v0 = vstv %s3861_s6 }
   0x2   :  { %15 = vst [vmem:[#allocation5] sm:$0x1] %v14_v0 }
   0x3   :  { %16 = vsyncpa [#allocation7], 0 }
   0x4   :  { %18 = vsyncpa [#allocation7 + $0x1], 0 }
   0x5   :  { %19 = vsyncpa [#allocation10], 0 }
   0x6   :  { %20 = vsyncpa [#allocation8], 0  ;;  %s3161_s11 = smov 0   ;;  %s3163_s12 = smov 0  }
   0x7   :  { %s3165_s13 = smov 0   ;;  %s3167_s14 = smov 0  }
   0x8 LB: > { %s3180_s6 = sadd.s32 4294967295, %s3094_s14   ;;  %p46_p0 = scmp.ne.s32.totalorder %s3086_s12, %s3082_s11  ;;  %s3094_s14 = sphi %s3167_s14, %s3880_s14   ;;  %s3090_s13 = sphi %s3165_s13, %s3879_s13   ;;  %s3086_s12 = sphi %s3163_s12, %s3878_s12   ;;  %s3082_s11 = sphi %s3161_s11, %s3877_s11  }
   0x9   : > { %p3865_p1 = scmp.eq.s32.totalorder %s3180_s6, 0  ;;  %p2275_p2 = scmp.ge.s32.totalorder %s3094_s14, 1 }
   0xa   : > { %p246_p3 = scmp.lt.s32.totalorder %s3094_s14, 4  ;;  %s3096_s17 = smov [#allocation9]  }
   0xb   : > { %p3189_p5 = por %p3865_p1, %p46_p0  ;;  %s258_s18 = sshll.u32 %s3096_s17, 4  ;;  %s259_s18 = int_to_ptr.vmem [resolvable:$true] %s258_s18 }
   0xc   : > { %p3193_p6 = pnand %p2275_p2, %p246_p3  ;;  %s3206_s20 = sadd.s32 1, %s3094_s14  }
   0xd   : > { %s3868_s15 = scalar_select %p3189_p5, 1, 0 }
   0xe   : > { %s3869_s16 = scalar_select %p3193_p6, 1, 0 }
   0xf   : > { %p2581_p7 = pneg %p3193_p6  ;;  %s33_s21 = sadd.s32 1, %s3090_s13 }
  0x10   : > { %s30_s22 = ssub.s32 %s3094_s14, %s3206_s20  ;;  %s2968_s25 = scalar_lea.hbm %s3856_s1, 8192 }
  0x11   : > { %p3201_p8 = pnand %p2581_p7, %p3865_p1  ;;  %p2969_p9 = scmp.ne.s32.totalorder %s3856_s1, %s2968_s25 }
  0x12   : > { %p2975_p13 = scmp.lt.u32.totalorder %s2968_s25, %s3856_s1 }
  0x13   : > { %p2970_p10 = pneg %p3201_p8 }
  0x15   : > { %p2971_p11 = pnand %p2970_p10, %p2969_p9 }
  0x17   : > { %p2972_p12 = pneg %p2971_p11 }
  0x19   : > { %p2977_p0 = pnand %p2975_p13, %p2972_p12 }
  0x1b   : > { %2980 = shalt.err (!%p2977_p0)
}
  0x1c   : > { %s2981_s30 = scalar_lea.vmem %s259_s18, 8192  ;;  %p2989_p4 = scmp.lt.s32.totalorder %s259_s18, %s259_s18 }
  0x1d   : > { %p2982_p2 = scmp.ne.s32.totalorder %s259_s18, %s2981_s30  ;;  %p2990_p1 = scmp.lt.s32.totalorder %s2981_s30, %s2981_s30 }
  0x1f   : > { %p2984_p3 = pnand %p2982_p2, %p2970_p10  ;;  %p2991_p5 = por %p2990_p1, %p2989_p4 }
  0x21   : > { %p2985_p7 = pneg %p2984_p3 }
  0x23   : > { %p2992_p6 = pnand %p2991_p5, %p2985_p7 }
  0x25   : > { %2995 = shalt.err (!%p2992_p6)
}
  0x26   : > { %s3097_s10 = smov 128   ;;  %s3098_s11 = smov 8  }
  0x27   : > { %2584 = dma.hbm_to_vmem [thread:$0]  (!%p3201_p8), %s3856_s1, 8192, %s259_s18, [#allocation10], %s3097_s10, %s3097_s10, %s3098_s11  }
  0x28   : > { %p31_p9 = scmp.eq.s32.totalorder %s30_s22, 0  ;;  %p40_p10 = scmp.ne.s32.totalorder %s3090_s13, %s3086_s12 }
  0x29   : > { %p41_p1 = scmp.eq.s32.totalorder %s3094_s14, 0  ;;  %p2590_p4 = scmp.lt.s32.totalorder %s3094_s14, 3 }
  0x2a   : > { %s3232_s24 = scalar_select %p31_p9, %s3090_s13, %s33_s21  }
  0x2b   : > { %p42_p5 = por %p41_p1, %p40_p10  ;;  %s293_s25 = sand.u32 1, %s3090_s13  }
  0x2c   : > { %s2278_s26 = sshll.u32 %s293_s25, 8  ;;  %s2439_s27 = sshll.u32 %s3094_s14, 12 }
  0x2d   : > { %s3239_s30 = scalar_lea.hbm %s3855_s0, %s2439_s27  ;;  %s297_s18 = scalar_lea.vmem [#allocation6], %s2278_s26 }
  0x2e   : > { %s305_s19 = sshll.u32 %s297_s18, 4  ;;  %p3243_p6 = pnand %p2590_p4, %p42_p5  ;;  %s3241_s19 = int_to_ptr.vmem [resolvable:$true] %s305_s19 }
  0x2f   : > { %s3247_s14 = scalar_lea.sflag [#allocation7], %s293_s25  ;;  %s2996_s22 = scalar_lea.hbm %s3239_s30, 4096 }
  0x30   : > { %p2997_p8 = scmp.ne.s32.totalorder %s3239_s30, %s2996_s22  ;;  %p2998_p11 = pneg %p3243_p6 }
  0x31   : > { %s3001_s17 = scalar_lea.hbm %s3855_s0, 12288  ;;  %p3002_p0 = scmp.lt.u32.totalorder %s3239_s30, %s3855_s0 }
  0x32   : > { %p2999_p12 = pnand %p2998_p11, %p2997_p8  ;;  %p3003_p2 = scmp.lt.u32.totalorder %s3001_s17, %s2996_s22 }
  0x33   : > { %p3005_p7 = scmp.lt.u32.totalorder %s2996_s22, %s3239_s30 }
  0x34   : > { %p3000_p13 = pneg %p2999_p12  ;;  %p3004_p3 = por %p3003_p2, %p3002_p0 }
  0x36   : > { %p3006_p9 = por %p3005_p7, %p3004_p3 }
  0x38   : > { %p3007_p10 = pnand %p3006_p9, %p3000_p13 }
  0x3a   : > { %3010 = shalt.err (!%p3007_p10)
}
  0x3b   : > { %s3011_s25 = scalar_lea.vmem %s3241_s19, 4096  ;;  %s3099_s27 = smov [#allocation6]  }
  0x3c   : > { %p3012_p1 = scmp.ne.s32.totalorder %s3241_s19, %s3011_s25  ;;  %s3016_s28 = sshll.u32 %s3099_s27, 4  ;;  %s3017_s28 = int_to_ptr.vmem [resolvable:$false] %s3016_s28 }
  0x3d   : > { %s3018_s29 = scalar_lea.vmem %s3017_s28, 8192  ;;  %p3019_p8 = scmp.lt.s32.totalorder %s3241_s19, %s3017_s28 }
  0x3e   : > { %p3014_p4 = pnand %p3012_p1, %p2998_p11  ;;  %p3020_p12 = scmp.lt.s32.totalorder %s3018_s29, %s3011_s25 }
  0x40   : > { %p3015_p5 = pneg %p3014_p4  ;;  %p3021_p0 = por %p3020_p12, %p3019_p8 }
  0x42   : > { %p3022_p2 = pnand %p3021_p0, %p3015_p5 }
  0x44   : > { %3025 = shalt.err (!%p3022_p2)
}
  0x45   : > { %s3100_s18 = smov 256   ;;  %s3101_s22 = smov 16  }
  0x46   : > { %2588 = dma.hbm_to_vmem [thread:$0]  (!%p3243_p6), %s3239_s30, 4096, %s3241_s19, %s3247_s14, %s3100_s18, %s3100_s18, %s3101_s22  }
  0x47   : > { %p3872_p11 = scmp.ne.s32.totalorder %s3869_s16, 0 }
  0x48   : > { %s319_s10 = sand.u32 (!%p3872_p11), 1, %s3086_s12   ;;  %p3873_p13 = scmp.ne.s32.totalorder (!%p3872_p11), %s3868_s15, 0 }
  0x49   : > { %317 = sbr.rel (%p3872_p11) target bundleno = 1828 (0x724), region = 56  ;;  %s2283_s11 = sshll.u32 (!%p3872_p11), %s319_s10, 8 }
  0x4a   : > { %s320_s17 = scalar_lea.sflag (!%p3872_p11), [#allocation7], %s319_s10  ;;  %s3278_s23 = scalar_lea.vmem (!%p3872_p11), [#allocation6], %s2283_s11 }
  0x50   : > { %3069 = dma.done.wait (%p3873_p13), %s320_s17, 4096  }
  0x51   : > { %3071 = vsyncadd (%p3873_p13), %s320_s17, 4294963200  ;;  %p3874_p3 = scmp.eq.s32.totalorder %s3180_s6, 0 }
  0x53   : > { %3073 = dma.done.wait (%p3874_p3), [#allocation10], 8192   ;;  %p3875_p6 = pmov %p3874_p3 }
  0x54   : > { %p3876_p7 = scmp.ne.s32.totalorder %s3180_s6, 0 }
  0x55   : > { %3075 = vsyncadd (%p3875_p6), [#allocation10], 4294959104  ;;  %vm363_vm0 = vcmask (!%p3876_p7), 0   ;;  %v366_v1 = vlaneseq (!%p3876_p7)  ;;  %v3102_v2 = vmov (!%p3876_p7), -1e+30   ;;  %v3103_v3 = vmov (!%p3876_p7), 0.0  }
  0x56   : > { %362 = sbr.rel (%p3876_p7) target bundleno = 93 (0x5d), region = 68  ;;  %364 = vst.msk [vmem:[#allocation2] sm:$0x1] (!%p3876_p7), %vm363_vm0, %v3102_v2  ;;  %365 = vst.msk [vmem:[#allocation3] sm:$0x1] (!%p3876_p7), %vm363_vm0, %v3103_v3 }
  0x57   : > { %vm368_vm1 = vcmp.lt.s32.totalorder (!%p3876_p7), %v366_v1, 256 }
  0x58   : > { %370 = vst.msk [vmem:[#allocation4] sm:$0x3] (!%p3876_p7), %vm368_vm1, %v3103_v3 }
  0x5d PF: > { %v2639_v4 = vld [vmem:[#allocation9 + $0x4] ss:$8 sps:$4 sm:$0xff]   ;;  %v2641_v5 = vld [vmem:[#allocation9] ss:$8 sps:$4 sm:$0xff]   ;;  %v2642_v6 = vld [vmem:[#allocation9 + $0x14] ss:$8 sps:$4 sm:$0xff]  }
  0x5e   : > { %959 = vmatprep.subr.bf16.mxu0 %v2639_v4  ;;  %v2644_v7 = vld [vmem:[#allocation9 + $0x10] ss:$8 sps:$4 sm:$0xff]   ;;  %v2645_v8 = vld [vmem:[#allocation9 + $0x24] ss:$8 sps:$4 sm:$0xff]   ;;  %v2647_v9 = vld [vmem:[#allocation9 + $0x20] ss:$8 sps:$4 sm:$0xff]  }
  0x5f   : > { %960 = vmatpush1.bf16.msra.mxu0 %v2641_v5  ;;  %v2648_v10 = vld [vmem:[#allocation9 + $0x34] ss:$8 sps:$4 sm:$0xff]   ;;  %v2650_v11 = vld [vmem:[#allocation9 + $0x30] ss:$8 sps:$4 sm:$0xff]   ;;  %v2651_v12 = vld [vmem:[#allocation9 + $0x44] ss:$8 sps:$4 sm:$0xff]  }
  0x60   : > { %961 = vmatprep.subr.bf16.mxu0 %v2642_v6  ;;  %v2653_v13 = vld [vmem:[#allocation9 + $0x40] ss:$8 sps:$4 sm:$0xff]   ;;  %v2654_v14 = vld [vmem:[#allocation9 + $0x54] ss:$8 sps:$4 sm:$0xff]   ;;  %v2656_v15 = vld [vmem:[#allocation9 + $0x50] ss:$8 sps:$4 sm:$0xff]  }
  0x61   : > { %v2657_v16 = vld [vmem:[#allocation9 + $0x64] ss:$8 sps:$4 sm:$0xff]   ;;  %v2659_v18 = vld [vmem:[#allocation9 + $0x60] ss:$8 sps:$4 sm:$0xff]   ;;  %v2660_v19 = vld [vmem:[#allocation9 + $0x74] ss:$8 sps:$4 sm:$0xff]  }
  0x62   : > { %v2689_v17 = vld [vmem:[%s3278_s23 + $0x4] ss:$16 sps:$4 sm:$0xff]   ;;  %v2662_v20 = vld [vmem:[#allocation9 + $0x70] ss:$8 sps:$4 sm:$0xff]   ;;  %v2665_v22 = vld [vmem:[#allocation9 + $0x80] ss:$8 sps:$4 sm:$0xff]  }
  0x63   : > { %962 = vmatpush1.bf16.msra.mxu0 %v2644_v7  ;;  %991 = vmatprep.mubr.bf16.mxu0 %v2689_v17  ;;  %v2663_v21 = vld [vmem:[#allocation9 + $0x84] ss:$8 sps:$4 sm:$0xff]   ;;  %v2666_v23 = vld [vmem:[#allocation9 + $0x94] ss:$8 sps:$4 sm:$0xff]   ;;  %v2668_v24 = vld [vmem:[#allocation9 + $0x90] ss:$8 sps:$4 sm:$0xff]  }
  0x64   : > { %963 = vmatprep.subr.bf16.mxu0 %v2645_v8  ;;  %v2669_v25 = vld [vmem:[#allocation9 + $0xa4] ss:$8 sps:$4 sm:$0xff]   ;;  %v2671_v26 = vld [vmem:[#allocation9 + $0xa0] ss:$8 sps:$4 sm:$0xff]   ;;  %v2672_v27 = vld [vmem:[#allocation9 + $0xb4] ss:$8 sps:$4 sm:$0xff]  }
  0x65   : > { %v2674_v28 = vld [vmem:[#allocation9 + $0xb0] ss:$8 sps:$4 sm:$0xff]   ;;  %v2675_v29 = vld [vmem:[#allocation9 + $0xc4] ss:$8 sps:$4 sm:$0xff]   ;;  %v2677_v30 = vld [vmem:[#allocation9 + $0xc0] ss:$8 sps:$4 sm:$0xff]  }
  0x66   : > { %v2678_v31 = vld [vmem:[#allocation9 + $0xd4] ss:$8 sps:$4 sm:$0xff]   ;;  %v2680_v32 = vld [vmem:[#allocation9 + $0xd0] ss:$8 sps:$4 sm:$0xff]   ;;  %v2681_v33 = vld [vmem:[#allocation9 + $0xe4] ss:$8 sps:$4 sm:$0xff]  }
  0x67   : > { %964 = vmatpush1.bf16.msra.mxu0 %v2647_v9  ;;  %v2683_v34 = vld [vmem:[#allocation9 + $0xe0] ss:$8 sps:$4 sm:$0xff]   ;;  %v2684_v35 = vld [vmem:[#allocation9 + $0xf4] ss:$8 sps:$4 sm:$0xff]   ;;  %v2686_v36 = vld [vmem:[#allocation9 + $0xf0] ss:$8 sps:$4 sm:$0xff]  }
  0x68   : > { %965 = vmatprep.subr.bf16.mxu0 %v2648_v10  ;;  %v2692_v37 = vld [vmem:[#allocation9 + $0x104] ss:$8 sps:$4 sm:$0xff]   ;;  %v2687_v38 = vld [vmem:[%s3278_s23] ss:$16 sps:$4 sm:$0xff]   ;;  %v2695_v40 = vld [vmem:[#allocation9 + $0x114] ss:$8 sps:$4 sm:$0xff]  }
  0x69   : > { %v2690_v39 = vld [vmem:[#allocation9 + $0x100] ss:$8 sps:$4 sm:$0xff]   ;;  %v2696_v41 = vld [vmem:[%s3278_s23 + $0x24] ss:$16 sps:$4 sm:$0xff]   ;;  %v2693_v45 = vld [vmem:[#allocation9 + $0x110] ss:$8 sps:$4 sm:$0xff]  }
  0x6a   : > { %v2783_v42 = vld [vmem:[%s3858_s3 + $0x4] ss:$8 sps:$4 sm:$0xff]   ;;  %v2785_v43 = vld [vmem:[%s3858_s3] ss:$8 sps:$4 sm:$0xff]   ;;  %v2786_v44 = vld [vmem:[%s3858_s3 + $0x14] ss:$8 sps:$4 sm:$0xff]  }
  0x6b   : > { %966 = vmatpush1.bf16.msra.mxu0 %v2650_v11  ;;  %1437 = vmatprep.subr.bf16.mxu1 %v2783_v42  ;;  %v2701_v46 = vld [vmem:[#allocation9 + $0x124] ss:$8 sps:$4 sm:$0xff]   ;;  %v2698_v49 = vld [vmem:[%s3278_s23 + $0x20] ss:$16 sps:$4 sm:$0xff]   ;;  %v2704_v51 = vld [vmem:[#allocation9 + $0x134] ss:$8 sps:$4 sm:$0xff]  }
  0x6c   : > { %967 = vmatprep.subr.bf16.mxu0 %v2651_v12  ;;  %1438 = vmatpush1.bf16.msra.mxu1 %v2785_v43  ;;  %v2788_v47 = vld [vmem:[%s3858_s3 + $0x10] ss:$8 sps:$4 sm:$0xff]   ;;  %v2789_v48 = vld [vmem:[%s3858_s3 + $0x24] ss:$8 sps:$4 sm:$0xff]   ;;  %v2791_v53 = vld [vmem:[%s3858_s3 + $0x20] ss:$8 sps:$4 sm:$0xff]  }
  0x6d   : > { %1439 = vmatprep.subr.bf16.mxu1 %v2786_v44  ;;  %v2699_v50 = vld [vmem:[#allocation9 + $0x120] ss:$8 sps:$4 sm:$0xff]   ;;  %v2705_v52 = vld [vmem:[%s3278_s23 + $0x44] ss:$16 sps:$4 sm:$0xff]   ;;  %v2702_v55 = vld [vmem:[#allocation9 + $0x130] ss:$8 sps:$4 sm:$0xff]  }
  0x6e   : > { %v2792_v54 = vld [vmem:[%s3858_s3 + $0x34] ss:$8 sps:$4 sm:$0xff]   ;;  %v2794_v57 = vld [vmem:[%s3858_s3 + $0x30] ss:$8 sps:$4 sm:$0xff]   ;;  %v2795_v58 = vld [vmem:[%s3858_s3 + $0x44] ss:$8 sps:$4 sm:$0xff]  }
  0x6f   : > { %968 = vmatpush1.bf16.msra.mxu0 %v2653_v13  ;;  %v2710_v56 = vld [vmem:[#allocation9 + $0x144] ss:$8 sps:$4 sm:$0xff]   ;;  %v2707_v59 = vld [vmem:[%s3278_s23 + $0x40] ss:$16 sps:$4 sm:$0xff]   ;;  %v2713_v61 = vld [vmem:[#allocation9 + $0x154] ss:$8 sps:$4 sm:$0xff]  }
  0x70   : > { %969 = vmatprep.subr.bf16.mxu0 %v2654_v14  ;;  %1440 = vmatpush1.bf16.msra.mxu1 %v2788_v47  ;;  %v2708_v60 = vld [vmem:[#allocation9 + $0x140] ss:$8 sps:$4 sm:$0xff]   ;;  %v2714_v62 = vld [vmem:[%s3278_s23 + $0x64] ss:$16 sps:$4 sm:$0xff]   ;;  %v2711_v1 = vld [vmem:[#allocation9 + $0x150] ss:$8 sps:$4 sm:$0xff]  }
  0x71   : > { %1441 = vmatprep.subr.bf16.mxu1 %v2789_v48  ;;  %v2797_v63 = vld [vmem:[%s3858_s3 + $0x40] ss:$8 sps:$4 sm:$0xff]   ;;  %v2798_v0 = vld [vmem:[%s3858_s3 + $0x54] ss:$8 sps:$4 sm:$0xff]   ;;  %v2800_v3 = vld [vmem:[%s3858_s3 + $0x50] ss:$8 sps:$4 sm:$0xff]  }
  0x72   : > { %v2719_v2 = vld [vmem:[#allocation9 + $0x164] ss:$8 sps:$4 sm:$0xff]   ;;  %v2716_v5 = vld [vmem:[%s3278_s23 + $0x60] ss:$16 sps:$4 sm:$0xff]   ;;  %v2722_v8 = vld [vmem:[#allocation9 + $0x174] ss:$8 sps:$4 sm:$0xff]  }
  0x73   : > { %970 = vmatpush1.bf16.msra.mxu0 %v2656_v15  ;;  %v2801_v4 = vld [vmem:[%s3858_s3 + $0x64] ss:$8 sps:$4 sm:$0xff]   ;;  %v2803_v9 = vld [vmem:[%s3858_s3 + $0x60] ss:$8 sps:$4 sm:$0xff]   ;;  %v2804_v10 = vld [vmem:[%s3858_s3 + $0x74] ss:$8 sps:$4 sm:$0xff]  }
  0x74   : > { %971 = vmatprep.subr.bf16.mxu0 %v2657_v16  ;;  %1442 = vmatpush1.bf16.msra.mxu1 %v2791_v53  ;;  %v2717_v6 = vld [vmem:[#allocation9 + $0x160] ss:$8 sps:$4 sm:$0xff]   ;;  %v2723_v7 = vld [vmem:[%s3278_s23 + $0x84] ss:$16 sps:$4 sm:$0xff]   ;;  %v2720_v11 = vld [vmem:[#allocation9 + $0x170] ss:$8 sps:$4 sm:$0xff]  }
  0x75   : > { %1443 = vmatprep.subr.bf16.mxu1 %v2792_v54  ;;  %v2728_v12 = vld [vmem:[#allocation9 + $0x184] ss:$8 sps:$4 sm:$0xff]   ;;  %v2725_v15 = vld [vmem:[%s3278_s23 + $0x80] ss:$16 sps:$4 sm:$0xff]   ;;  %v2758_v47 = vld [vmem:[#allocation9 + $0x1f4] ss:$8 sps:$4 sm:$0xff]  }
  0x76   : > { %v2806_v13 = vld [vmem:[%s3858_s3 + $0x70] ss:$8 sps:$4 sm:$0xff]   ;;  %v2807_v14 = vld [vmem:[%s3858_s3 + $0x84] ss:$8 sps:$4 sm:$0xff]   ;;  %s2432_s14 = sshll.u32 %s3180_s6, 7  ;;  %vm1824_vm3 = vcmask 7168  }
  0x77   : > { %972 = vmatpush1.bf16.msra.mxu0 %v2659_v18  ;;  %v2726_v16 = vld [vmem:[#allocation9 + $0x180] ss:$8 sps:$4 sm:$0xff]   ;;  %v2732_v17 = vld [vmem:[%s3278_s23 + $0xa4] ss:$16 sps:$4 sm:$0xff]   ;;  %v2756_v48 = vld [vmem:[#allocation9 + $0x1f0] ss:$8 sps:$4 sm:$0xff]  }
  0x78   : > { %973 = vmatprep.subr.bf16.mxu0 %v2660_v19  ;;  %1444 = vmatpush1.bf16.msra.mxu1 %v2794_v57  ;;  %v2731_v18 = vld [vmem:[#allocation9 + $0x194] ss:$8 sps:$4 sm:$0xff]   ;;  %v2755_v42 = vld [vmem:[#allocation9 + $0x1e4] ss:$8 sps:$4 sm:$0xff]   ;;  %v2752_v44 = vld [vmem:[%s3278_s23 + $0xe0] ss:$16 sps:$4 sm:$0xff]  }
  0x79   : > { %1445 = vmatprep.subr.bf16.mxu1 %v2795_v58  ;;  %v2809_v19 = vld [vmem:[%s3858_s3 + $0x80] ss:$8 sps:$4 sm:$0xff]   ;;  %v2824_v43 = vld [vmem:[%s3858_s3 + $0xd0] ss:$8 sps:$4 sm:$0xff]   ;;  %p2433_p9 = scmp.ne.s32.totalorder %s3180_s6, 2 }
  0x7a   : > { %v2767_v53 = vld [vmem:[%s3278_s23 + $0x48] ss:$16 sps:$4 sm:$0xff]   ;;  %v2768_v54 = vld [vmem:[%s3278_s23 + $0x6c] ss:$16 sps:$4 sm:$0xff]  }
  0x7b   : > { %974 = vmatpush1.bf16.msra.mxu0 %v2662_v20  ;;  %v2810_v20 = vld [vmem:[%s3858_s3 + $0x94] ss:$8 sps:$4 sm:$0xff]  }
  0x7c   : > { %975 = vmatprep.subr.bf16.mxu0 %v2663_v21  ;;  %1446 = vmatpush1.bf16.msra.mxu1 %v2797_v63  ;;  %v2729_v21 = vld [vmem:[#allocation9 + $0x190] ss:$8 sps:$4 sm:$0xff]   ;;  %v2774_v58 = vld [vmem:[%s3278_s23 + $0xac] ss:$16 sps:$4 sm:$0xff]  }
  0x7d   : > { %1447 = vmatprep.subr.bf16.mxu1 %v2798_v0  ;;  %v2773_v57 = vld [vmem:[%s3278_s23 + $0x88] ss:$16 sps:$4 sm:$0xff]  }
  0x7e   : > { %v2782_v63 = vld [vmem:[%s3278_s23 + $0xe8] ss:$16 sps:$4 sm:$0xff]  }
  0x7f   : > { %976 = vmatpush1.bf16.msra.mxu0 %v2665_v22  ;;  %v2737_v22 = vld [vmem:[#allocation9 + $0x1a4] ss:$8 sps:$4 sm:$0xff]  }
  0x80   : > { %977 = vmatprep.subr.bf16.mxu0 %v2666_v23  ;;  %1448 = vmatpush1.bf16.msra.mxu1 %v2800_v3  ;;  %v2812_v23 = vld [vmem:[%s3858_s3 + $0x90] ss:$8 sps:$4 sm:$0xff]   ;;  %v2825_v0 = vld [vmem:[%s3858_s3 + $0xe4] ss:$8 sps:$4 sm:$0xff]  }
  0x81   : > { %1449 = vmatprep.subr.bf16.mxu1 %v2801_v4  ;;  %v2830_v3 = vld [vmem:[%s3858_s3 + $0xf0] ss:$8 sps:$4 sm:$0xff]   ;;  %v469_v4 = vlaneseq }
  0x83   : > { %978 = vmatpush1.bf16.msra.mxu0 %v2668_v24  ;;  %v2813_v24 = vld [vmem:[%s3858_s3 + $0xa4] ss:$8 sps:$4 sm:$0xff]  }
  0x84   : > { %979 = vmatprep.subr.bf16.mxu0 %v2669_v25  ;;  %1450 = vmatpush1.bf16.msra.mxu1 %v2803_v9  ;;  %v2734_v25 = vld [vmem:[%s3278_s23 + $0xa0] ss:$16 sps:$4 sm:$0xff]  }
  0x85   : > { %1451 = vmatprep.subr.bf16.mxu1 %v2804_v10 }
  0x87   : > { %980 = vmatpush1.bf16.msra.mxu0 %v2671_v26  ;;  %v2735_v26 = vld [vmem:[#allocation9 + $0x1a0] ss:$8 sps:$4 sm:$0xff]  }
  0x88   : > { %981 = vmatprep.subr.bf16.mxu0 %v2672_v27  ;;  %1452 = vmatpush1.bf16.msra.mxu1 %v2806_v13  ;;  %v2741_v27 = vld [vmem:[%s3278_s23 + $0xc4] ss:$16 sps:$4 sm:$0xff]  }
  0x89   : > { %1453 = vmatprep.subr.bf16.mxu1 %v2807_v14 }
  0x8b   : > { %982 = vmatpush1.bf16.msra.mxu0 %v2674_v28  ;;  %v2740_v28 = vld [vmem:[#allocation9 + $0x1b4] ss:$8 sps:$4 sm:$0xff]  }
  0x8c   : > { %983 = vmatprep.subr.bf16.mxu0 %v2675_v29  ;;  %1454 = vmatpush1.bf16.msra.mxu1 %v2809_v19  ;;  %v2815_v29 = vld [vmem:[%s3858_s3 + $0xa0] ss:$8 sps:$4 sm:$0xff]  }
  0x8d   : > { %1455 = vmatprep.subr.bf16.mxu1 %v2810_v20 }
  0x8f   : > { %984 = vmatpush1.bf16.msra.mxu0 %v2677_v30  ;;  %v2816_v30 = vld [vmem:[%s3858_s3 + $0xb4] ss:$8 sps:$4 sm:$0xff]  }
  0x90   : > { %985 = vmatprep.subr.bf16.mxu0 %v2678_v31  ;;  %1456 = vmatpush1.bf16.msra.mxu1 %v2812_v23  ;;  %v2738_v31 = vld [vmem:[#allocation9 + $0x1b0] ss:$8 sps:$4 sm:$0xff]  }
  0x91   : > { %1457 = vmatprep.subr.bf16.mxu1 %v2813_v24 }
  0x93   : > { %986 = vmatpush1.bf16.msra.mxu0 %v2680_v32  ;;  %v2746_v32 = vld [vmem:[#allocation9 + $0x1c4] ss:$8 sps:$4 sm:$0xff]  }
  0x94   : > { %987 = vmatprep.subr.bf16.mxu0 %v2681_v33  ;;  %1458 = vmatpush1.bf16.msra.mxu1 %v2815_v29  ;;  %v2818_v33 = vld [vmem:[%s3858_s3 + $0xb0] ss:$8 sps:$4 sm:$0xff]  }
  0x95   : > { %1459 = vmatprep.subr.bf16.mxu1 %v2816_v30 }
  0x97   : > { %988 = vmatpush1.bf16.msra.mxu0 %v2683_v34  ;;  %v2819_v34 = vld [vmem:[%s3858_s3 + $0xc4] ss:$8 sps:$4 sm:$0xff]  }
  0x98   : > { %989 = vmatprep.subr.bf16.mxu0 %v2684_v35  ;;  %v2743_v35 = vld [vmem:[%s3278_s23 + $0xc0] ss:$16 sps:$4 sm:$0xff]   ;;  %1460 = vmatpush1.bf16.msra.mxu1 %v2818_v33 }
  0x99   : > { %1461 = vmatprep.subr.bf16.mxu1 %v2819_v34 }
  0x9b   : > { %990 = vmatpush1.bf16.msra.mxu0 %v2686_v36  ;;  %v2744_v36 = vld [vmem:[#allocation9 + $0x1c0] ss:$8 sps:$4 sm:$0xff]  }
  0x9c   : > { %1072 = vmatprep.subr.bf16.mxu0 %v2692_v37  ;;  %v2750_v37 = vld [vmem:[%s3278_s23 + $0xe4] ss:$16 sps:$4 sm:$0xff]  }
  0x9e   : > { %992 = vmatmul.mubr.bf16.vlgmr.msra.gmra.mrb[0].mxu0 %v2687_v38  ;;  %v2749_v38 = vld [vmem:[#allocation9 + $0x1d4] ss:$8 sps:$4 sm:$0xff]  }
  0x9f   : > { %1073 = vmatpush1.bf16.msra.mxu0 %v2690_v39  ;;  %1001 = vmatprep.mubr.bf16.mxu0 %v2696_v41  ;;  %v2821_v39 = vld [vmem:[%s3858_s3 + $0xc0] ss:$8 sps:$4 sm:$0xff]  }
  0xa0   : > { %1074 = vmatprep.subr.bf16.mxu0 %v2695_v40  ;;  %v2822_v40 = vld [vmem:[%s3858_s3 + $0xd4] ss:$8 sps:$4 sm:$0xff]   ;;  %1462 = vmatpush1.bf16.msra.mxu1 %v2821_v39 }
  0xa1   : > { %v2747_v41 = vld [vmem:[#allocation9 + $0x1d0] ss:$8 sps:$4 sm:$0xff]   ;;  %1463 = vmatprep.subr.bf16.mxu1 %v2822_v40 }
  0xa3   : > { %1075 = vmatpush1.bf16.msra.mxu0 %v2693_v45  ;;  %v2753_v45 = vld [vmem:[#allocation9 + $0x1e0] ss:$8 sps:$4 sm:$0xff]  }
  0xa4   : > { %1076 = vmatprep.subr.bf16.mxu0 %v2701_v46  ;;  %v2761_v46 = vld [vmem:[%s3278_s23 + $0xc] ss:$16 sps:$4 sm:$0xff]   ;;  %1464 = vmatpush1.bf16.msra.mxu1 %v2824_v43 }
  0xa5   : > { %1465 = vmatprep.subr.bf16.mxu1 %v2825_v0 }
  0xa6   : > { %1002 = vmatmul.mubr.bf16.gmra.mrb[4].mxu0 %v2698_v49  ;;  %v2759_v49 = vld [vmem:[%s3278_s23 + $0x8] ss:$16 sps:$4 sm:$0xff]  }
  0xa7   : > { %1077 = vmatpush1.bf16.msra.mxu0 %v2699_v50  ;;  %1011 = vmatprep.mubr.bf16.mxu0 %v2705_v52  ;;  %v2762_v50 = vld [vmem:[%s3278_s23 + $0x2c] ss:$16 sps:$4 sm:$0xff]  }
  0xa8   : > { %1078 = vmatprep.subr.bf16.mxu0 %v2704_v51  ;;  %v2764_v51 = vld [vmem:[%s3278_s23 + $0x28] ss:$16 sps:$4 sm:$0xff]   ;;  %v2765_v52 = vld [vmem:[%s3278_s23 + $0x4c] ss:$16 sps:$4 sm:$0xff]  }
  0xab   : > { %1079 = vmatpush1.bf16.msra.mxu0 %v2702_v55  ;;  %v2770_v55 = vld [vmem:[%s3278_s23 + $0x68] ss:$16 sps:$4 sm:$0xff]  }
  0xac   : > { %1080 = vmatprep.subr.bf16.mxu0 %v2710_v56  ;;  %v2771_v56 = vld [vmem:[%s3278_s23 + $0x8c] ss:$16 sps:$4 sm:$0xff]  }
  0xae   : > { %1012 = vmatmul.mubr.bf16.gmra.mrb[8].mxu0 %v2707_v59  ;;  %v2776_v59 = vld [vmem:[%s3278_s23 + $0xa8] ss:$16 sps:$4 sm:$0xff]  }
  0xaf   : > { %1081 = vmatpush1.bf16.msra.mxu0 %v2708_v60  ;;  %1021 = vmatprep.mubr.bf16.mxu0 %v2714_v62  ;;  %v2777_v60 = vld [vmem:[%s3278_s23 + $0xcc] ss:$16 sps:$4 sm:$0xff]  }
  0xb0   : > { %1082 = vmatprep.subr.bf16.mxu0 %v2713_v61  ;;  %v2779_v61 = vld [vmem:[%s3278_s23 + $0xc8] ss:$16 sps:$4 sm:$0xff]   ;;  %v2780_v62 = vld [vmem:[%s3278_s23 + $0xec] ss:$16 sps:$4 sm:$0xff]  }
  0xb3   : > { %1083 = vmatpush1.bf16.msra.mxu0 %v2711_v1  ;;  %v2827_v1 = vld [vmem:[%s3858_s3 + $0xe0] ss:$8 sps:$4 sm:$0xff]  }
  0xb4   : > { %1084 = vmatprep.subr.bf16.mxu0 %v2719_v2  ;;  %1466 = vmatpush1.bf16.msra.mxu1 %v2827_v1  ;;  %v2828_v2 = vld [vmem:[%s3858_s3 + $0xf4] ss:$8 sps:$4 sm:$0xff]  }
  0xb5   : > { %1467 = vmatprep.subr.bf16.mxu1 %v2828_v2 }
  0xb6   : > { %1022 = vmatmul.mubr.bf16.gmra.mrb[12].mxu0 %v2716_v5  ;;  %v3419_v5 = vshrl.u32 %v469_v4, 7 }
  0xb7   : > { %1085 = vmatpush1.bf16.msra.mxu0 %v2717_v6  ;;  %1031 = vmatprep.mubr.bf16.mxu0 %v2723_v7  ;;  %v467_v7 = vld [vmem:[%s3857_s2] sm:$0x3] }
  0xb8   : > { %1086 = vmatprep.subr.bf16.mxu0 %v2722_v8  ;;  %1468 = vmatpush1.bf16.msra.mxu1 %v2830_v3  ;;  %v3422_v6 = vsub.s32 0, %v3419_v5  ;;  %v3428_v8 = vsub.s32 1, %v3419_v5 }
  0xba   : > { %v3431_v9 = vrot.slane %v467_v7, %v3422_v6  ;;  %v3434_v10 = vrot.slane %v467_v7, %v3428_v8 }
  0xbb   : > { %1087 = vmatpush1.bf16.msra.mxu0 %v2720_v11 }
  0xbc   : > { %1088 = vmatprep.subr.bf16.mxu0 %v2728_v12 }
  0xbe   : > { %1032 = vmatmul.mubr.bf16.gmra.mrb[16].mxu0 %v2725_v15 }
  0xbf   : > { %1089 = vmatpush1.bf16.msra.mxu0 %v2726_v16  ;;  %1041 = vmatprep.mubr.bf16.mxu0 %v2732_v17 }
  0xc0   : > { %1090 = vmatprep.subr.bf16.mxu0 %v2731_v18 }
  0xc3   : > { %1091 = vmatpush1.bf16.msra.mxu0 %v2729_v21 }
  0xc4   : > { %1092 = vmatprep.subr.bf16.mxu0 %v2737_v22 }
  0xc6   : > { %1042 = vmatmul.mubr.bf16.gmra.mrb[20].mxu0 %v2734_v25 }
  0xc7   : > { %1093 = vmatpush1.bf16.msra.mxu0 %v2735_v26  ;;  %1051 = vmatprep.mubr.bf16.mxu0 %v2741_v27 }
  0xc8   : > { %1094 = vmatprep.subr.bf16.mxu0 %v2740_v28 }
  0xcb   : > { %1095 = vmatpush1.bf16.msra.mxu0 %v2738_v31 }
  0xcc   : > { %1096 = vmatprep.subr.bf16.mxu0 %v2746_v32 }
  0xce   : > { %1052 = vmatmul.mubr.bf16.gmra.mrb[24].mxu0 %v2743_v35 }
  0xcf   : > { %1097 = vmatpush1.bf16.msra.mxu0 %v2744_v36  ;;  %1061 = vmatprep.mubr.bf16.mxu0 %v2750_v37 }
  0xd0   : > { %1098 = vmatprep.subr.bf16.mxu0 %v2749_v38 }
  0xd3   : > { %1099 = vmatpush1.bf16.msra.mxu0 %v2747_v41 }
  0xd4   : > { %1100 = vmatprep.subr.bf16.mxu0 %v2755_v42 }
  0xd6   : > { %1062 = vmatmul.mubr.bf16.gmra.mrb[28].mxu0 %v2752_v44 }
  0xd7   : > { %1101 = vmatpush1.bf16.msra.mxu0 %v2753_v45  ;;  %1104 = vmatprep.mubr.bf16.mxu0 %v2761_v46 }
  0xd8   : > { %1102 = vmatprep.subr.bf16.mxu0 %v2758_v47 }
  0xdb   : > { %1103 = vmatpush1.bf16.msra.mxu0 %v2756_v48 }
  0xde   : > { %1105 = vmatmul.mubr.bf16.vlgmr.msra.gmra.mrb[0].mxu0 %v2759_v49 }
  0xdf   : > { %1114 = vmatprep.mubr.bf16.mxu0 %v2762_v50 }
  0xe6   : > { %1115 = vmatmul.mubr.bf16.gmra.mrb[4].mxu0 %v2764_v51 }
  0xe7   : > { %1124 = vmatprep.mubr.bf16.mxu0 %v2765_v52 }
  0xee   : > { %1125 = vmatmul.mubr.bf16.gmra.mrb[8].mxu0 %v2767_v53 }
  0xef   : > { %1134 = vmatprep.mubr.bf16.mxu0 %v2768_v54 }
  0xf6   : > { %1135 = vmatmul.mubr.bf16.gmra.mrb[12].mxu0 %v2770_v55 }
  0xf7   : > { %1144 = vmatprep.mubr.bf16.mxu0 %v2771_v56 }
  0xfe   : > { %1145 = vmatmul.mubr.bf16.gmra.mrb[16].mxu0 %v2773_v57 }
  0xff   : > { %1154 = vmatprep.mubr.bf16.mxu0 %v2774_v58 }
 0x106   : > { %1155 = vmatmul.mubr.bf16.gmra.mrb[20].mxu0 %v2776_v59 }
 0x107   : > { %1164 = vmatprep.mubr.bf16.mxu0 %v2777_v60 }
 0x10e   : > { %1165 = vmatmul.mubr.bf16.gmra.mrb[24].mxu0 %v2779_v61 }
 0x10f   : > { %1174 = vmatprep.mubr.bf16.mxu0 %v2780_v62 }
 0x116   : > { %1175 = vmatmul.mubr.bf16.gmra.mrb[28].mxu0 %v2782_v63 }
 0x1b1   : > { %v1106_v11 = vpop.f32.mrb[0].mxu0 }
 0x1b2   : > { %v2507_v12 = vadd.f32 %v1106_v11, %v3431_v9  ;;  %v1108_v13 = vpop.f32.mrb[1].mxu0 }
 0x1b3   : > { %v2508_v14 = vadd.f32 %v1108_v13, %v3434_v10  ;;  %v1110_v15 = vpop.f32.mrb[2].mxu0 }
 0x1b4   : > { %v2509_v16 = vadd.f32 %v1110_v15, %v3431_v9  ;;  %v1112_v17 = vpop.f32.mrb[3].mxu0  ;;  %v1185_v19 = vmax.f32 %v2507_v12, 0.0 }
 0x1b5   : > { %v2510_v18 = vadd.f32 %v1112_v17, %v3434_v10  ;;  %v1186_v21 = vmax.f32 %v2508_v14, 0.0 }
 0x1b6   : > { %v1187_v20 = vmax.f32 %v2509_v16, 0.0 }
 0x1b7   : > { %v1188_v22 = vmax.f32 %v2510_v18, 0.0 }
 0x1b8   : > { %v1217_v23 = vpack.c.bf16 %v1187_v20, %v1185_v19 }
 0x1b9   : > { %v1116_v24 = vpop.f32.mrb[4].mxu0  ;;  %v1218_v25 = vpack.c.bf16 %v1188_v22, %v1186_v21 }
 0x1ba   : > { %v2511_v26 = vadd.f32 %v1116_v24, %v3431_v9  ;;  %v1118_v27 = vpop.f32.mrb[5].mxu0 }
 0x1bb   : > { %v2512_v28 = vadd.f32 %v1118_v27, %v3434_v10  ;;  %v1120_v29 = vpop.f32.mrb[6].mxu0  ;;  %1469 = vmatprep.mubr.bf16.mxu1 %v1218_v25  ;;  %1986 = vmatprep.subr.bf16.mxu1 %v1218_v25 }
 0x1bc   : > { %v2513_v30 = vadd.f32 %v1120_v29, %v3431_v9  ;;  %v1122_v31 = vpop.f32.mrb[7].mxu0  ;;  %1470 = vmatmul.mubr.bf16.vlgmr.msra.gmra.mrb[0].mxu1 %v1217_v23  ;;  %v1189_v33 = vmax.f32 %v2511_v26, 0.0 }
 0x1bd   : > { %v2514_v32 = vadd.f32 %v1122_v31, %v3434_v10  ;;  %1987 = vmatpush1.bf16.msra.mxu1 %v1217_v23  ;;  %v1190_v35 = vmax.f32 %v2512_v28, 0.0 }
 0x1be   : > { %v1191_v34 = vmax.f32 %v2513_v30, 0.0 }
 0x1bf   : > { %v1192_v36 = vmax.f32 %v2514_v32, 0.0 }
 0x1c0   : > { %v1219_v37 = vpack.c.bf16 %v1191_v34, %v1189_v33 }
 0x1c1   : > { %v1220_v38 = vpack.c.bf16 %v1192_v36, %v1190_v35  ;;  %v1126_v39 = vpop.f32.mrb[8].mxu0 }
 0x1c2   : > { %v2515_v40 = vadd.f32 %v1126_v39, %v3431_v9  ;;  %v1128_v41 = vpop.f32.mrb[9].mxu0 }
 0x1c3   : > { %v2516_v42 = vadd.f32 %v1128_v41, %v3434_v10  ;;  %v1130_v43 = vpop.f32.mrb[10].mxu0  ;;  %1479 = vmatprep.mubr.bf16.mxu1 %v1220_v38  ;;  %1988 = vmatprep.subr.bf16.mxu1 %v1220_v38 }
 0x1c4   : > { %v2517_v44 = vadd.f32 %v1130_v43, %v3431_v9  ;;  %v1132_v45 = vpop.f32.mrb[11].mxu0  ;;  %1480 = vmatmul.mubr.bf16.gmra.mrb[4].mxu1 %v1219_v37  ;;  %v1193_v47 = vmax.f32 %v2515_v40, 0.0 }
 0x1c5   : > { %v2518_v46 = vadd.f32 %v1132_v45, %v3434_v10  ;;  %1989 = vmatpush1.bf16.msra.mxu1 %v1219_v37  ;;  %v1194_v49 = vmax.f32 %v2516_v42, 0.0 }
 0x1c6   : > { %v1195_v48 = vmax.f32 %v2517_v44, 0.0 }
 0x1c7   : > { %v1196_v50 = vmax.f32 %v2518_v46, 0.0 }
 0x1c8   : > { %v1221_v51 = vpack.c.bf16 %v1195_v48, %v1193_v47 }
 0x1c9   : > { %v1222_v52 = vpack.c.bf16 %v1196_v50, %v1194_v49  ;;  %v1136_v53 = vpop.f32.mrb[12].mxu0 }
 0x1ca   : > { %v2519_v54 = vadd.f32 %v1136_v53, %v3431_v9  ;;  %v1138_v55 = vpop.f32.mrb[13].mxu0 }
 0x1cb   : > { %v2520_v56 = vadd.f32 %v1138_v55, %v3434_v10  ;;  %v1140_v57 = vpop.f32.mrb[14].mxu0  ;;  %1489 = vmatprep.mubr.bf16.mxu1 %v1222_v52  ;;  %1990 = vmatprep.subr.bf16.mxu1 %v1222_v52 }
 0x1cc   : > { %v2521_v58 = vadd.f32 %v1140_v57, %v3431_v9  ;;  %v1142_v59 = vpop.f32.mrb[15].mxu0  ;;  %1490 = vmatmul.mubr.bf16.gmra.mrb[8].mxu1 %v1221_v51  ;;  %v1197_v61 = vmax.f32 %v2519_v54, 0.0 }
 0x1cd   : > { %v2522_v60 = vadd.f32 %v1142_v59, %v3434_v10  ;;  %1991 = vmatpush1.bf16.msra.mxu1 %v1221_v51  ;;  %v1198_v63 = vmax.f32 %v2520_v56, 0.0 }
 0x1ce   : > { %v1199_v62 = vmax.f32 %v2521_v58, 0.0 }
 0x1cf   : > { %v1200_v0 = vmax.f32 %v2522_v60, 0.0 }
 0x1d0   : > { %v1223_v1 = vpack.c.bf16 %v1199_v62, %v1197_v61 }
 0x1d1   : > { %v1224_v2 = vpack.c.bf16 %v1200_v0, %v1198_v63  ;;  %v1146_v3 = vpop.f32.mrb[16].mxu0 }
 0x1d2   : > { %v2523_v7 = vadd.f32 %v1146_v3, %v3431_v9  ;;  %v1148_v11 = vpop.f32.mrb[17].mxu0 }
 0x1d3   : > { %v2524_v12 = vadd.f32 %v1148_v11, %v3434_v10  ;;  %v1150_v13 = vpop.f32.mrb[18].mxu0  ;;  %1499 = vmatprep.mubr.bf16.mxu1 %v1224_v2  ;;  %1992 = vmatprep.subr.bf16.mxu1 %v1224_v2 }
 0x1d4   : > { %v2525_v14 = vadd.f32 %v1150_v13, %v3431_v9  ;;  %v1152_v15 = vpop.f32.mrb[19].mxu0  ;;  %1500 = vmatmul.mubr.bf16.gmra.mrb[12].mxu1 %v1223_v1  ;;  %v1201_v17 = vmax.f32 %v2523_v7, 0.0 }
 0x1d5   : > { %v2526_v16 = vadd.f32 %v1152_v15, %v3434_v10  ;;  %1993 = vmatpush1.bf16.msra.mxu1 %v1223_v1  ;;  %v1202_v19 = vmax.f32 %v2524_v12, 0.0  ;;  %v1265_v1 = vld [vmem:[%s3859_s4] sm:$0x3] }
 0x1d6   : > { %v1203_v18 = vmax.f32 %v2525_v14, 0.0 }
 0x1d7   : > { %v1204_v20 = vmax.f32 %v2526_v16, 0.0 }
 0x1d8   : > { %v1225_v21 = vpack.c.bf16 %v1203_v18, %v1201_v17  ;;  %v3477_v17 = vrot.slane %v1265_v1, %v3422_v6 }
 0x1d9   : > { %v1226_v22 = vpack.c.bf16 %v1204_v20, %v1202_v19  ;;  %v1156_v23 = vpop.f32.mrb[20].mxu0 }
 0x1da   : > { %v2527_v24 = vadd.f32 %v1156_v23, %v3431_v9  ;;  %v1158_v25 = vpop.f32.mrb[21].mxu0 }
 0x1db   : > { %v2528_v26 = vadd.f32 %v1158_v25, %v3434_v10  ;;  %v1160_v27 = vpop.f32.mrb[22].mxu0  ;;  %1509 = vmatprep.mubr.bf16.mxu1 %v1226_v22  ;;  %1994 = vmatprep.subr.bf16.mxu1 %v1226_v22 }
 0x1dc   : > { %v2529_v28 = vadd.f32 %v1160_v27, %v3431_v9  ;;  %v1162_v29 = vpop.f32.mrb[23].mxu0  ;;  %1510 = vmatmul.mubr.bf16.gmra.mrb[16].mxu1 %v1225_v21  ;;  %v1205_v31 = vmax.f32 %v2527_v24, 0.0 }
 0x1dd   : > { %v2530_v30 = vadd.f32 %v1162_v29, %v3434_v10  ;;  %1995 = vmatpush1.bf16.msra.mxu1 %v1225_v21  ;;  %v1206_v33 = vmax.f32 %v2528_v26, 0.0 }
 0x1de   : > { %v1207_v32 = vmax.f32 %v2529_v28, 0.0 }
 0x1df   : > { %v1208_v34 = vmax.f32 %v2530_v30, 0.0 }
 0x1e0   : > { %v1227_v35 = vpack.c.bf16 %v1207_v32, %v1205_v31 }
 0x1e1   : > { %v1228_v36 = vpack.c.bf16 %v1208_v34, %v1206_v33  ;;  %v1166_v37 = vpop.f32.mrb[24].mxu0 }
 0x1e2   : > { %v2531_v38 = vadd.f32 %v1166_v37, %v3431_v9  ;;  %v1168_v39 = vpop.f32.mrb[25].mxu0 }
 0x1e3   : > { %v2532_v40 = vadd.f32 %v1168_v39, %v3434_v10  ;;  %v1170_v41 = vpop.f32.mrb[26].mxu0  ;;  %1519 = vmatprep.mubr.bf16.mxu1 %v1228_v36  ;;  %1996 = vmatprep.subr.bf16.mxu1 %v1228_v36 }
 0x1e4   : > { %v2533_v42 = vadd.f32 %v1170_v41, %v3431_v9  ;;  %v1172_v43 = vpop.f32.mrb[27].mxu0  ;;  %1520 = vmatmul.mubr.bf16.gmra.mrb[20].mxu1 %v1227_v35  ;;  %v1209_v45 = vmax.f32 %v2531_v38, 0.0 }
 0x1e5   : > { %v2534_v44 = vadd.f32 %v1172_v43, %v3434_v10  ;;  %1997 = vmatpush1.bf16.msra.mxu1 %v1227_v35  ;;  %v1210_v47 = vmax.f32 %v2532_v40, 0.0 }
 0x1e6   : > { %v1211_v46 = vmax.f32 %v2533_v42, 0.0 }
 0x1e7   : > { %v1212_v48 = vmax.f32 %v2534_v44, 0.0 }
 0x1e8   : > { %v1229_v49 = vpack.c.bf16 %v1211_v46, %v1209_v45 }
 0x1e9   : > { %v1230_v50 = vpack.c.bf16 %v1212_v48, %v1210_v47  ;;  %v1176_v51 = vpop.f32.mrb[28].mxu0 }
 0x1ea   : > { %v2535_v52 = vadd.f32 %v1176_v51, %v3431_v9  ;;  %v1178_v53 = vpop.f32.mrb[29].mxu0 }
 0x1eb   : > { %v2536_v54 = vadd.f32 %v1178_v53, %v3434_v10  ;;  %v1180_v55 = vpop.f32.mrb[30].mxu0  ;;  %1529 = vmatprep.mubr.bf16.mxu1 %v1230_v50  ;;  %1998 = vmatprep.subr.bf16.mxu1 %v1230_v50  ;;  %v3492_v53 = vld [vmem:[%s3860_s5] ss:$0 sm:$0xff] }
 0x1ec   : > { %v2537_v56 = vadd.f32 %v1180_v55, %v3431_v9  ;;  %v1182_v57 = vpop.f32.mrb[31].mxu0  ;;  %1530 = vmatmul.mubr.bf16.gmra.mrb[24].mxu1 %v1229_v49  ;;  %v1213_v59 = vmax.f32 %v2535_v52, 0.0  ;;  %v3472_v9 = vrot.slane %v1265_v1, %v3428_v8 }
 0x1ed   : > { %v2538_v58 = vadd.f32 %v1182_v57, %v3434_v10  ;;  %1999 = vmatpush1.bf16.msra.mxu1 %v1229_v49  ;;  %v1214_v61 = vmax.f32 %v2536_v54, 0.0 }
 0x1ee   : > { %v1215_v60 = vmax.f32 %v2537_v56, 0.0 }
 0x1ef   : > { %v1216_v62 = vmax.f32 %v2538_v58, 0.0 }
 0x1f0   : > { %v1231_v63 = vpack.c.bf16 %v1215_v60, %v1213_v59 }
 0x1f1   : > { %v1232_v0 = vpack.c.bf16 %v1216_v62, %v1214_v61 }
 0x1f3   : > { %1539 = vmatprep.mubr.bf16.mxu1 %v1232_v0  ;;  %2000 = vmatprep.subr.bf16.mxu1 %v1232_v0 }
 0x1f4   : > { %1540 = vmatmul.mubr.bf16.gmra.mrb[28].mxu1 %v1231_v63 }
 0x1f5   : > { %2001 = vmatpush1.bf16.msra.mxu1 %v1231_v63 }
 0x28f   : > { %v1471_v2 = vpop.f32.mrb[0].mxu1 }
 0x290   : > { %v1473_v10 = vpop.f32.mrb[1].mxu1  ;;  %v1472_v23 = vadd.f32 %v1471_v2, %v3477_v17 }
 0x291   : > { %v1474_v3 = vadd.f32 %v1473_v10, %v3472_v9  ;;  %v1475_v7 = vpop.f32.mrb[2].mxu1 }
 0x292   : > { %v1477_v11 = vpop.f32.mrb[3].mxu1  ;;  %v1476_v26 = vadd.f32 %v1475_v7, %v3477_v17 }
 0x293   : > { %v2414_v12 = vmul.f32 -1.442695, %v1474_v3  ;;  %v1478_v13 = vadd.f32 %v1477_v11, %v3472_v9 }
 0x295   : > { %2831 = vpow2.f32 %v2414_v12  ;;  %v2415_v14 = vmul.f32 -1.442695, %v1478_v13 }
 0x297   : > { %2833 = vpow2.f32 %v2415_v14  ;;  %v1481_v15 = vpop.f32.mrb[4].mxu1 }
 0x298   : > { %v1483_v16 = vpop.f32.mrb[5].mxu1  ;;  %v1482_v37 = vadd.f32 %v1481_v15, %v3477_v17 }
 0x299   : > { %v1484_v18 = vadd.f32 %v1483_v16, %v3472_v9  ;;  %v1485_v19 = vpop.f32.mrb[6].mxu1 }
 0x29a   : > { %v1487_v20 = vpop.f32.mrb[7].mxu1  ;;  %v1486_v40 = vadd.f32 %v1485_v19, %v3477_v17 }
 0x29b   : > { %v2416_v21 = vmul.f32 -1.442695, %v1484_v18  ;;  %v1488_v22 = vadd.f32 %v1487_v20, %v3472_v9 }
 0x29d   : > { %2835 = vpow2.f32 %v2416_v21  ;;  %v2417_v24 = vmul.f32 -1.442695, %v1488_v22 }
 0x29f   : > { %v2832_v25 = vpop.eup %2831  ;;  %2837 = vpow2.f32 %v2417_v24  ;;  %v1491_v27 = vpop.f32.mrb[8].mxu1 }
 0x2a0   : > { %v1614_v28 = vadd.f32 1.0, %v2832_v25  ;;  %v1493_v29 = vpop.f32.mrb[9].mxu1  ;;  %2839 = vtanh.f32 %v1472_v23  ;;  %v1492_v55 = vadd.f32 %v1491_v27, %v3477_v17 }
 0x2a1   : > { %v2834_v30 = vpop.eup %2833  ;;  %v1494_v31 = vadd.f32 %v1493_v29, %v3472_v9  ;;  %v1495_v32 = vpop.f32.mrb[10].mxu1 }
 0x2a2   : > { %2841 = vrcp.f32 %v1614_v28  ;;  %v1615_v33 = vadd.f32 1.0, %v2834_v30  ;;  %v1497_v34 = vpop.f32.mrb[11].mxu1  ;;  %v1496_v60 = vadd.f32 %v1495_v32, %v3477_v17 }
 0x2a3   : > { %2843 = vtanh.f32 %v1476_v26  ;;  %v2418_v35 = vmul.f32 -1.442695, %v1494_v31  ;;  %v1498_v36 = vadd.f32 %v1497_v34, %v3472_v9 }
 0x2a4   : > { %2845 = vrcp.f32 %v1615_v33 }
 0x2a5   : > { %2847 = vpow2.f32 %v2418_v35  ;;  %v2419_v38 = vmul.f32 -1.442695, %v1498_v36 }
 0x2a7   : > { %v2836_v39 = vpop.eup %2835  ;;  %2849 = vpow2.f32 %v2419_v38  ;;  %v1501_v41 = vpop.f32.mrb[12].mxu1 }
 0x2a8   : > { %v1616_v42 = vadd.f32 1.0, %v2836_v39  ;;  %v1503_v43 = vpop.f32.mrb[13].mxu1  ;;  %2851 = vtanh.f32 %v1482_v37  ;;  %v1502_v19 = vadd.f32 %v1501_v41, %v3477_v17 }
 0x2a9   : > { %v2838_v44 = vpop.eup %2837  ;;  %v1504_v45 = vadd.f32 %v1503_v43, %v3472_v9  ;;  %v1505_v46 = vpop.f32.mrb[14].mxu1 }
 0x2aa   : > { %2853 = vrcp.f32 %v1616_v42  ;;  %v1617_v47 = vadd.f32 1.0, %v2838_v44  ;;  %v1507_v48 = vpop.f32.mrb[15].mxu1  ;;  %v2840_v49 = vpop.eup %2839  ;;  %v1506_v24 = vadd.f32 %v1505_v46, %v3477_v17 }
 0x2ab   : > { %2855 = vtanh.f32 %v1486_v40  ;;  %v2420_v50 = vmul.f32 -1.442695, %v1504_v45  ;;  %v1508_v51 = vadd.f32 %v1507_v48, %v3472_v9 }
 0x2ac   : > { %v2842_v52 = vpop.eup %2841  ;;  %2857 = vrcp.f32 %v1617_v47 }
 0x2ad   : > { %v2844_v54 = vpop.eup %2843  ;;  %2859 = vpow2.f32 %v2420_v50  ;;  %v2421_v56 = vmul.f32 -1.442695, %v1508_v51  ;;  %v1662_v57 = vmul.f32 %v2842_v52, %v2840_v49 }
 0x2ae   : > { %v2846_v58 = vpop.eup %2845 }
 0x2af   : > { %v2848_v59 = vpop.eup %2847  ;;  %2861 = vpow2.f32 %v2421_v56  ;;  %v1511_v61 = vpop.f32.mrb[16].mxu1  ;;  %v1685_v62 = vmul.f32 %v3492_v53, %v1662_v57  ;;  %v1663_v63 = vmul.f32 %v2846_v58, %v2844_v54 }
 0x2b0   : > { %v1618_v0 = vadd.f32 1.0, %v2848_v59  ;;  %v1513_v1 = vpop.f32.mrb[17].mxu1  ;;  %2863 = vtanh.f32 %v1492_v55  ;;  %v1512_v41 = vadd.f32 %v1511_v61, %v3477_v17 }
 0x2b1   : > { %v2850_v2 = vpop.eup %2849  ;;  %v1514_v10 = vadd.f32 %v1513_v1, %v3472_v9  ;;  %v1515_v3 = vpop.f32.mrb[18].mxu1  ;;  %1701 = vadd.xlane.f32.xlu0 %v1685_v62  ;;  %v1686_v15 = vmul.f32 %v3492_v53, %v1663_v63 }
 0x2b2   : > { %2865 = vrcp.f32 %v1618_v0  ;;  %v1619_v7 = vadd.f32 1.0, %v2850_v2  ;;  %v1517_v11 = vpop.f32.mrb[19].mxu1  ;;  %v2852_v12 = vpop.eup %2851  ;;  %v1516_v46 = vadd.f32 %v1515_v3, %v3477_v17 }
 0x2b3   : > { %2867 = vtanh.f32 %v1496_v60  ;;  %v2422_v13 = vmul.f32 -1.442695, %v1514_v10  ;;  %v1518_v14 = vadd.f32 %v1517_v11, %v3472_v9 }
 0x2b4   : > { %v2854_v16 = vpop.eup %2853  ;;  %2869 = vrcp.f32 %v1619_v7 }
 0x2b5   : > { %v2856_v18 = vpop.eup %2855  ;;  %2871 = vpow2.f32 %v2422_v13  ;;  %v2423_v20 = vmul.f32 -1.442695, %v1518_v14  ;;  %1703 = vadd.xlane.f32.xlu0 %v1686_v15  ;;  %v1664_v21 = vmul.f32 %v2854_v16, %v2852_v12 }
 0x2b6   : > { %v2858_v22 = vpop.eup %2857 }
 0x2b7   : > { %v2860_v23 = vpop.eup %2859  ;;  %2873 = vpow2.f32 %v2423_v20  ;;  %v1521_v25 = vpop.f32.mrb[20].mxu1  ;;  %v1687_v26 = vmul.f32 %v3492_v53, %v1664_v21  ;;  %v1665_v27 = vmul.f32 %v2858_v22, %v2856_v18 }
 0x2b8   : > { %v1620_v28 = vadd.f32 1.0, %v2860_v23  ;;  %v1523_v29 = vpop.f32.mrb[21].mxu1  ;;  %2875 = vtanh.f32 %v1502_v19  ;;  %v1522_v0 = vadd.f32 %v1521_v25, %v3477_v17 }
 0x2b9   : > { %v2862_v30 = vpop.eup %2861  ;;  %v1524_v31 = vadd.f32 %v1523_v29, %v3472_v9  ;;  %v1525_v32 = vpop.f32.mrb[22].mxu1  ;;  %1705 = vadd.xlane.f32.xlu1 %v1687_v26  ;;  %v1688_v38 = vmul.f32 %v3492_v53, %v1665_v27 }
 0x2ba   : > { %2877 = vrcp.f32 %v1620_v28  ;;  %v1621_v33 = vadd.f32 1.0, %v2862_v30  ;;  %v1527_v34 = vpop.f32.mrb[23].mxu1  ;;  %v2864_v35 = vpop.eup %2863  ;;  %v1526_v7 = vadd.f32 %v1525_v32, %v3477_v17 }
 0x2bb   : > { %2879 = vtanh.f32 %v1506_v24  ;;  %v2424_v36 = vmul.f32 -1.442695, %v1524_v31  ;;  %v1528_v37 = vadd.f32 %v1527_v34, %v3472_v9 }
 0x2bc   : > { %v2866_v39 = vpop.eup %2865  ;;  %2881 = vrcp.f32 %v1621_v33 }
 0x2bd   : > { %v2868_v40 = vpop.eup %2867  ;;  %2883 = vpow2.f32 %v2424_v36  ;;  %v2425_v42 = vmul.f32 -1.442695, %v1528_v37  ;;  %1707 = vadd.xlane.f32.xlu1 %v1688_v38  ;;  %v1666_v43 = vmul.f32 %v2866_v39, %v2864_v35 }
 0x2be   : > { %v2870_v44 = vpop.eup %2869 }
 0x2bf   : > { %v2872_v45 = vpop.eup %2871  ;;  %2885 = vpow2.f32 %v2425_v42  ;;  %v1531_v47 = vpop.f32.mrb[24].mxu1  ;;  %v1689_v48 = vmul.f32 %v3492_v53, %v1666_v43  ;;  %v1667_v49 = vmul.f32 %v2870_v44, %v2868_v40 }
 0x2c0   : > { %v1622_v50 = vadd.f32 1.0, %v2872_v45  ;;  %v1533_v51 = vpop.f32.mrb[25].mxu1  ;;  %2887 = vtanh.f32 %v1512_v41  ;;  %v1532_v28 = vadd.f32 %v1531_v47, %v3477_v17 }
 0x2c1   : > { %v2874_v52 = vpop.eup %2873  ;;  %v1534_v54 = vadd.f32 %v1533_v51, %v3472_v9  ;;  %v1535_v55 = vpop.f32.mrb[26].mxu1  ;;  %1709 = vadd.xlane.f32.xlu0 %v1689_v48  ;;  %v1690_v56 = vmul.f32 %v3492_v53, %v1667_v49 }
 0x2c2   : > { %2889 = vrcp.f32 %v1622_v50  ;;  %v1623_v57 = vadd.f32 1.0, %v2874_v52  ;;  %v1537_v58 = vpop.f32.mrb[27].mxu1  ;;  %v2876_v59 = vpop.eup %2875  ;;  %v1536_v33 = vadd.f32 %v1535_v55, %v3477_v17 }
 0x2c3   : > { %2891 = vtanh.f32 %v1516_v46  ;;  %v2426_v60 = vmul.f32 -1.442695, %v1534_v54  ;;  %v1538_v61 = vadd.f32 %v1537_v58, %v3472_v9  ;;  %1711 = vadd.xlane.f32.xlu1 %v1690_v56 }
 0x2c4   : > { %v2878_v62 = vpop.eup %2877  ;;  %2893 = vrcp.f32 %v1623_v57 }
 0x2c5   : > { %v2880_v63 = vpop.eup %2879  ;;  %2895 = vpow2.f32 %v2426_v60  ;;  %v2427_v1 = vmul.f32 -1.442695, %v1538_v61  ;;  %v1668_v2 = vmul.f32 %v2878_v62, %v2876_v59 }
 0x2c6   : > { %v2882_v10 = vpop.eup %2881 }
 0x2c7   : > { %v2884_v3 = vpop.eup %2883  ;;  %2897 = vpow2.f32 %v2427_v1  ;;  %v1541_v11 = vpop.f32.mrb[28].mxu1  ;;  %v1691_v12 = vmul.f32 %v3492_v53, %v1668_v2  ;;  %v1669_v13 = vmul.f32 %v2882_v10, %v2880_v63 }
 0x2c8   : > { %v1624_v14 = vadd.f32 1.0, %v2884_v3  ;;  %v1543_v15 = vpop.f32.mrb[29].mxu1  ;;  %2899 = vtanh.f32 %v1522_v0  ;;  %v1542_v42 = vadd.f32 %v1541_v11, %v3477_v17 }
 0x2c9   : > { %v2886_v16 = vpop.eup %2885  ;;  %v1544_v18 = vadd.f32 %v1543_v15, %v3472_v9  ;;  %v1545_v19 = vpop.f32.mrb[30].mxu1  ;;  %1713 = vadd.xlane.f32.xlu0 %v1691_v12  ;;  %v1692_v20 = vmul.f32 %v3492_v53, %v1669_v13  ;;  %v1759_v15 = vadd.s32 8, %v3419_v5 }
 0x2ca   : > { %2901 = vrcp.f32 %v1624_v14  ;;  %v1625_v21 = vadd.f32 1.0, %v2886_v16  ;;  %v1547_v22 = vpop.f32.mrb[31].mxu1  ;;  %v2888_v23 = vpop.eup %2887  ;;  %v1546_v46 = vadd.f32 %v1545_v19, %v3477_v17  ;;  %v1774_v16 = vstv %s2432_s14 }
 0x2cb   : > { %2903 = vtanh.f32 %v1526_v7  ;;  %v2428_v24 = vmul.f32 -1.442695, %v1544_v18  ;;  %v1548_v25 = vadd.f32 %v1547_v22, %v3472_v9  ;;  %1715 = vadd.xlane.f32.xlu1 %v1692_v20  ;;  %v3104_v7 = vmov 0  }
 0x2cc   : > { %v2890_v26 = vpop.eup %2889  ;;  %2905 = vrcp.f32 %v1625_v21  ;;  %2637 = vset.pattern.permute.xlu1 %v3104_v7  ;;  %2018 = vmatprep.mubr.bf16.mxu1 %v3104_v7  ;;  %v1760_v18 = vadd.s32 16, %v3419_v5  ;;  %v1761_v19 = vadd.s32 24, %v3419_v5  ;;  %v1763_v22 = vadd.s32 40, %v3419_v5 }
 0x2cd   : > { %v2892_v27 = vpop.eup %2891  ;;  %2907 = vpow2.f32 %v2428_v24  ;;  %v2429_v29 = vmul.f32 -1.442695, %v1548_v25  ;;  %v1670_v30 = vmul.f32 %v2890_v26, %v2888_v23  ;;  %v1764_v23 = vadd.s32 48, %v3419_v5 }
 0x2ce   : > { %v2894_v31 = vpop.eup %2893  ;;  %v1775_v24 = vadd.s32 %v1774_v16, %v3419_v5  ;;  %v1776_v25 = vadd.s32 %v1774_v16, %v1759_v15  ;;  %v1765_v26 = vadd.s32 56, %v3419_v5 }
 0x2cf   : > { %v2896_v32 = vpop.eup %2895  ;;  %2909 = vpow2.f32 %v2429_v29  ;;  %v1693_v34 = vmul.f32 %v3492_v53, %v1670_v30  ;;  %v1671_v35 = vmul.f32 %v2894_v31, %v2892_v27  ;;  %v1766_v27 = vadd.s32 64, %v3419_v5 }
 0x2d0   : > { %v1626_v36 = vadd.f32 1.0, %v2896_v32  ;;  %2911 = vtanh.f32 %v1532_v28  ;;  %v1777_v28 = vadd.s32 %v1774_v16, %v1760_v18  ;;  %v3542_v29 = vadd.s32 %v1774_v16, %v1761_v19 }
 0x2d1   : > { %v2898_v37 = vpop.eup %2897  ;;  %1717 = vadd.xlane.f32.xlu0 %v1693_v34  ;;  %v1694_v9 = vmul.f32 %v3492_v53, %v1671_v35  ;;  %v1780_v34 = vadd.s32 %v1774_v16, %v1763_v22  ;;  %v1768_v35 = vadd.s32 80, %v3419_v5  ;;  %vm1791_vm2 = vcmp.lt.s32.totalorder %v1775_v24, 300 }
 0x2d2   : > { %2913 = vrcp.f32 %v1626_v36  ;;  %v1627_v38 = vadd.f32 1.0, %v2898_v37  ;;  %v2900_v39 = vpop.eup %2899  ;;  %v1769_v36 = vadd.s32 88, %v3419_v5  ;;  %v1770_v37 = vadd.s32 96, %v3419_v5 }
 0x2d3   : > { %2915 = vtanh.f32 %v1536_v33  ;;  %1719 = vadd.xlane.f32.xlu1 %v1694_v9  ;;  %v1767_v33 = vadd.s32 72, %v3419_v5  ;;  %v1781_v9 = vadd.s32 %v1774_v16, %v1764_v23  ;;  %vm1792_vm4 = vcmp.lt.s32.totalorder %v1776_v25, 300 }
 0x2d4   : > { %v2902_v40 = vpop.eup %2901  ;;  %2917 = vrcp.f32 %v1627_v38  ;;  %v1771_v38 = vadd.s32 104, %v3419_v5  ;;  %vm1793_vm5 = vcmp.lt.s32.totalorder %v1777_v28, 300  ;;  %vm1794_vm6 = vcmp.lt.s32.totalorder %v3542_v29, 300 }
 0x2d5   : > { %v2904_v41 = vpop.eup %2903  ;;  %v1672_v43 = vmul.f32 %v2902_v40, %v2900_v39  ;;  %2919 = vtanh.f32 %v1542_v42  ;;  %v1772_v39 = vadd.s32 112, %v3419_v5  ;;  %v1782_v40 = vadd.s32 %v1774_v16, %v1765_v26  ;;  %v3550_v42 = vld [vmem:[#allocation5] ss:$0 sm:$0xff] }
 0x2d6   : > { %v2906_v44 = vpop.eup %2905  ;;  %vm1796_vm8 = vcmp.lt.s32.totalorder %v1780_v34, 300  ;;  %vm1797_vm9 = vcmp.lt.s32.totalorder %v1781_v9, 300 }
 0x2d7   : > { %v2908_v45 = vpop.eup %2907  ;;  %v1695_v47 = vmul.f32 %v3492_v53, %v1672_v43  ;;  %v1673_v48 = vmul.f32 %v2906_v44, %v2904_v41  ;;  %v1783_v41 = vadd.s32 %v1774_v16, %v1766_v27  ;;  %v1784_v44 = vadd.s32 %v1774_v16, %v1767_v33 }
 0x2d8   : > { %v1628_v49 = vadd.f32 1.0, %v2908_v45  ;;  %vm1798_vm10 = vcmp.lt.s32.totalorder %v1782_v40, 300 }
 0x2d9   : > { %v2910_v50 = vpop.eup %2909  ;;  %1721 = vadd.xlane.f32.xlu0 %v1695_v47  ;;  %v1696_v51 = vmul.f32 %v3492_v53, %v1673_v48  ;;  %v1786_v47 = vadd.s32 %v1774_v16, %v1769_v36  ;;  %v1787_v48 = vadd.s32 %v1774_v16, %v1770_v37  ;;  %vm1799_vm11 = vcmp.lt.s32.totalorder %v1783_v41, 300 }
 0x2da   : > { %2921 = vrcp.f32 %v1628_v49  ;;  %v1629_v52 = vadd.f32 1.0, %v2910_v50  ;;  %v2912_v54 = vpop.eup %2911  ;;  %v1788_v49 = vadd.s32 %v1774_v16, %v1771_v38  ;;  %v3553_v50 = vadd.s32 %v1774_v16, %v1772_v39 }
 0x2db   : > { %2923 = vtanh.f32 %v1546_v46  ;;  %1723 = vadd.xlane.f32.xlu1 %v1696_v51  ;;  %v1785_v46 = vadd.s32 %v1774_v16, %v1768_v35  ;;  %v1773_v51 = vadd.s32 120, %v3419_v5  ;;  %vm1800_vm12 = vcmp.lt.s32.totalorder %v1784_v44, 300 }
 0x2dc   : > { %v2914_v55 = vpop.eup %2913  ;;  %2925 = vrcp.f32 %v1629_v52  ;;  %vm1802_vm14 = vcmp.lt.s32.totalorder %v1786_v47, 300  ;;  %vm1803_vm15 = vcmp.lt.s32.totalorder %v1787_v48, 300  ;;  %vm1804_vm0 = vcmp.lt.s32.totalorder %v1788_v49, 300 }
 0x2dd   : > { %v2916_v56 = vpop.eup %2915  ;;  %v1674_v57 = vmul.f32 %v2914_v55, %v2912_v54  ;;  %vm1801_vm13 = vcmp.lt.s32.totalorder %v1785_v46, 300  ;;  %vm1805_vm1 = vcmp.lt.s32.totalorder %v3553_v50, 300 }
 0x2de   : > { %v2918_v58 = vpop.eup %2917 }
 0x2df   : > { %v1697_v17 = vmul.f32 %v3492_v53, %v1674_v57  ;;  %v1675_v59 = vmul.f32 %v2918_v58, %v2916_v56  ;;  %v2920_v61 = vpop.eup %2919 }
 0x2e1   : > { %1725 = vadd.xlane.f32.xlu0 %v1697_v17  ;;  %v1698_v60 = vmul.f32 %v3492_v53, %v1675_v59 }
 0x2e3   : > { %1727 = vadd.xlane.f32.xlu1 %v1698_v60 }
 0x2e4   : > { %v2922_v62 = vpop.eup %2921 }
 0x2e5   : > { %v2924_v63 = vpop.eup %2923  ;;  %v1676_v0 = vmul.f32 %v2922_v62, %v2920_v61  ;;  %v1790_v61 = vadd.s32 %v1774_v16, %v1773_v51 }
 0x2e6   : > { %v2926_v1 = vpop.eup %2925 }
 0x2e7   : > { %v1699_v2 = vmul.f32 %v3492_v53, %v1676_v0  ;;  %v1677_v10 = vmul.f32 %v2926_v1, %v2924_v63 }
 0x2e9   : > { %1729 = vadd.xlane.f32.xlu0 %v1699_v2  ;;  %v1700_v3 = vmul.f32 %v3492_v53, %v1677_v10  ;;  %v1762_v53 = vadd.s32 32, %v3419_v5 }
 0x2eb   : > { %1731 = vadd.xlane.f32.xlu1 %v1700_v3  ;;  %v1779_v30 = vadd.s32 %v1774_v16, %v1762_v53 }
 0x2ed   : > { %vm1795_vm7 = vcmp.lt.s32.totalorder %v1779_v30, 300 }
 0x33e   : > { %v1702_v11 = vpop.xlane.xlu0 %1701 }
 0x33f   : > { %v1740_v52 = vadd.f32 %v3550_v42, %v1702_v11 }
 0x341   : > { %v3565_v62 = vsel %vm1791_vm2, %v1740_v52, -1e+30  ;;  %vm1806_vm2 = vcmp.lt.s32.totalorder %v1790_v61, 300 }
 0x342   : > { %v1704_v13 = vpop.xlane.xlu0 %1703  ;;  %v1825_v19 = vsel %vm1824_vm3, %v3565_v62, -inf }
 0x343   : > { %v1741_v54 = vadd.f32 %v3550_v42, %v1704_v13 }
 0x345   : > { %v3568_v63 = vsel %vm1792_vm4, %v1741_v54, -1e+30  ;;  %vm1960_vm4 = vcmask 0  }
 0x346   : > { %v1706_v12 = vpop.xlane.xlu1 %1705  ;;  %v1826_v53 = vsel %vm1824_vm3, %v3568_v63, -inf }
 0x347   : > { %v1742_v55 = vadd.f32 %v3550_v42, %v1706_v12 }
 0x349   : > { %v3573_v2 = vsel %vm1793_vm5, %v1742_v55, -1e+30  ;;  %vm2194_vm5 = vcmask (!%p2433_p9), 8192  }
 0x34a   : > { %v1708_v14 = vpop.xlane.xlu1 %1707  ;;  %v1827_v25 = vsel %vm1824_vm3, %v3573_v2, -inf }
 0x34b   : > { %v1743_v60 = vadd.f32 %v3550_v42, %v1708_v14 }
 0x34e   : > { %v1710_v20 = vpop.xlane.xlu0 %1709 }
 0x34f   : > { %v1744_v56 = vadd.f32 %v3550_v42, %v1710_v20  ;;  %v3594_v20 = vsel %vm1794_vm6, %v1743_v60, -1e+30 }
 0x350   : > { %v1712_v21 = vpop.xlane.xlu1 %1711 }
 0x351   : > { %v1745_v57 = vadd.f32 %v3550_v42, %v1712_v21  ;;  %v3576_v10 = vsel %vm1795_vm7, %v1744_v56, -1e+30 }
 0x352   : > { %v1829_v21 = vsel %vm1824_vm3, %v3576_v10, -inf }
 0x353   : > { %v3579_v3 = vsel %vm1796_vm8, %v1745_v57, -1e+30  ;;  %v1830_v33 = vmax.f32 %v1825_v19, %v1829_v21 }
 0x354   : > { %v1831_v26 = vsel %vm1824_vm3, %v3579_v3, -inf }
 0x355   : > { %v1832_v37 = vmax.f32 %v1826_v53, %v1831_v26 }
 0x356   : > { %v1714_v31 = vpop.xlane.xlu0 %1713 }
 0x357   : > { %v1746_v59 = vadd.f32 %v3550_v42, %v1714_v31 }
 0x358   : > { %v1716_v32 = vpop.xlane.xlu1 %1715 }
 0x359   : > { %v1747_v0 = vadd.f32 %v3550_v42, %v1716_v32  ;;  %v3583_v14 = vsel %vm1797_vm9, %v1746_v59, -1e+30  ;;  %v1828_v32 = vsel %vm1824_vm3, %v3594_v20, -inf }
 0x35a   : > { %v1833_v27 = vsel %vm1824_vm3, %v3583_v14, -inf }
 0x35b   : > { %v3599_v22 = vsel %vm1798_vm10, %v1747_v0, -1e+30  ;;  %v1834_v40 = vmax.f32 %v1827_v25, %v1833_v27 }
 0x35c   : > { %v1835_v34 = vsel %vm1824_vm3, %v3599_v22, -inf }
 0x35d   : > { %v1836_v46 = vmax.f32 %v1828_v32, %v1835_v34 }
 0x35e   : > { %v1718_v43 = vpop.xlane.xlu0 %1717 }
 0x35f   : > { %v1748_v11 = vadd.f32 %v3550_v42, %v1718_v43 }
 0x360   : > { %v1720_v45 = vpop.xlane.xlu1 %1719 }
 0x361   : > { %v1749_v1 = vadd.f32 %v3550_v42, %v1720_v45  ;;  %v3612_v28 = vsel %vm1799_vm11, %v1748_v11, -1e+30 }
 0x362   : > { %v1837_v9 = vsel %vm1824_vm3, %v3612_v28, -inf }
 0x363   : > { %v3602_v23 = vsel %vm1800_vm12, %v1749_v1, -1e+30  ;;  %v1838_v51 = vmax.f32 %v1830_v33, %v1837_v9 }
 0x364   : > { %v1839_v35 = vsel %vm1824_vm3, %v3602_v23, -inf }
 0x365   : > { %v1840_v47 = vmax.f32 %v1832_v37, %v1839_v35 }
 0x366   : > { %v1722_v58 = vpop.xlane.xlu0 %1721 }
 0x367   : > { %v1750_v15 = vadd.f32 %v3550_v42, %v1722_v58 }
 0x368   : > { %v1724_v17 = vpop.xlane.xlu1 %1723 }
 0x369   : > { %v1751_v16 = vadd.f32 %v3550_v42, %v1724_v17  ;;  %v3615_v29 = vsel %vm1801_vm13, %v1750_v15, -1e+30 }
 0x36a   : > { %v1841_v41 = vsel %vm1824_vm3, %v3615_v29, -inf }
 0x36b   : > { %v3618_v30 = vsel %vm1802_vm14, %v1751_v16, -1e+30  ;;  %v1842_v55 = vmax.f32 %v1834_v40, %v1841_v41 }
 0x36c   : > { %v1843_v43 = vsel %vm1824_vm3, %v3618_v30, -inf }
 0x36d   : > { %v1844_v56 = vmax.f32 %v1836_v46, %v1843_v43 }
 0x36e   : > { %v1726_v12 = vpop.xlane.xlu0 %1725 }
 0x36f   : > { %v1752_v24 = vadd.f32 %v3550_v42, %v1726_v12 }
 0x370   : > { %v1728_v13 = vpop.xlane.xlu1 %1727 }
 0x371   : > { %v1753_v18 = vadd.f32 %v3550_v42, %v1728_v13  ;;  %v3632_v38 = vsel %vm1803_vm15, %v1752_v24, -1e+30 }
 0x372   : > { %v1845_v52 = vsel %vm1824_vm3, %v3632_v38, -inf }
 0x373   : > { %v3621_v31 = vsel %vm1804_vm0, %v1753_v18, -1e+30  ;;  %v1846_v17 = vmax.f32 %v1838_v51, %v1845_v52  ;;  %v1823_v18 = vld [vmem:[#allocation2] sm:$0x1] }
 0x374   : > { %v1847_v44 = vsel %vm1824_vm3, %v3621_v31, -inf }
 0x375   : > { %v1848_v57 = vmax.f32 %v1840_v47, %v1847_v44 }
 0x376   : > { %v1730_v36 = vpop.xlane.xlu0 %1729 }
 0x377   : > { %v1754_v39 = vadd.f32 %v3550_v42, %v1730_v36 }
 0x378   : > { %v1732_v45 = vpop.xlane.xlu1 %1731 }
 0x379   : > { %v3643_v48 = vsel %vm1805_vm1, %v1754_v39, -1e+30  ;;  %v1755_v49 = vadd.f32 %v3550_v42, %v1732_v45  ;;  %v1853_v42 = vmax.f32 %v1846_v17, %v1848_v57 }
 0x37a   : > { %v1849_v54 = vsel %vm1824_vm3, %v3643_v48, -inf }
 0x37b   : > { %v3651_v58 = vsel %vm1806_vm2, %v1755_v49, -1e+30  ;;  %v1850_v59 = vmax.f32 %v1842_v55, %v1849_v54 }
 0x37c   : > { %v1851_v50 = vsel %vm1824_vm3, %v3651_v58, -inf }
 0x37d   : > { %v1852_v60 = vmax.f32 %v1844_v56, %v1851_v50 }
 0x37f   : > { %v1854_v0 = vmax.f32 %v1850_v59, %v1852_v60 }
 0x381   : > { %v1855_v1 = vmax.f32 %v1853_v42, %v1854_v0 }
 0x383   : > { %v1856_v11 = vrot.slane %v1855_v1, 4 }
 0x385   : > { %v1857_v12 = vmax.f32 %v1855_v1, %v1856_v11 }
 0x387   : > { %v1858_v13 = vrot.slane %v1857_v12, 2 }
 0x389   : > { %v1859_v15 = vmax.f32 %v1857_v12, %v1858_v13 }
 0x38b   : > { %v1860_v16 = vrot.slane %v1859_v15, 1 }
 0x38d   : > { %v1861_v19 = vmax.f32 %v1859_v15, %v1860_v16 }
 0x38f   : > { %v1862_v61 = vmax.f32 %v1823_v18, %v1861_v19 }
 0x391   : > { %v1863_v53 = vsub.f32 %v1823_v18, %v1862_v61  ;;  %v3656_v21 = vrot.slane %v1862_v61, %v3422_v6  ;;  %2062 = vst.msk [vmem:[#allocation2] sm:$0x1] %vm1960_vm4, %v1862_v61 }
 0x393   : > { %v1864_v24 = vmul.f32 1.442695, %v1863_v53  ;;  %v1872_v25 = vsub.f32 %v3565_v62, %v3656_v21  ;;  %v1873_v26 = vsub.f32 %v3568_v63, %v3656_v21  ;;  %v1874_v27 = vsub.f32 %v3573_v2, %v3656_v21 }
 0x394   : > { %v1875_v32 = vsub.f32 %v3594_v20, %v3656_v21  ;;  %v1876_v35 = vsub.f32 %v3576_v10, %v3656_v21  ;;  %v1877_v62 = vsub.f32 %v3579_v3, %v3656_v21  ;;  %v1878_v2 = vsub.f32 %v3583_v14, %v3656_v21 }
 0x395   : > { %2927 = vpow2.f32 %v1864_v24  ;;  %v1888_v33 = vmul.f32 1.442695, %v1872_v25  ;;  %v1890_v34 = vmul.f32 1.442695, %v1873_v26  ;;  %v1892_v36 = vmul.f32 1.442695, %v1874_v27 }
 0x396   : > { %v1894_v37 = vmul.f32 1.442695, %v1875_v32  ;;  %v1896_v63 = vmul.f32 1.442695, %v1876_v35  ;;  %v1898_v20 = vmul.f32 1.442695, %v1877_v62  ;;  %v1879_v9 = vsub.f32 %v3599_v22, %v3656_v21 }
 0x397   : > { %2929 = vpow2.f32 %v1888_v33  ;;  %v1900_v39 = vmul.f32 1.442695, %v1878_v2  ;;  %v1880_v10 = vsub.f32 %v3612_v28, %v3656_v21  ;;  %v1881_v41 = vsub.f32 %v3602_v23, %v3656_v21 }
 0x398   : > { %2931 = vpow2.f32 %v1890_v34  ;;  %v1902_v3 = vmul.f32 1.442695, %v1879_v9  ;;  %v1882_v43 = vsub.f32 %v3615_v29, %v3656_v21  ;;  %v1883_v46 = vsub.f32 %v3618_v30, %v3656_v21 }
 0x399   : > { %2933 = vpow2.f32 %v1892_v36  ;;  %v1904_v14 = vmul.f32 1.442695, %v1880_v10  ;;  %v1906_v28 = vmul.f32 1.442695, %v1881_v41  ;;  %v1884_v29 = vsub.f32 %v3632_v38, %v3656_v21 }
 0x39a   : > { %2935 = vpow2.f32 %v1894_v37  ;;  %v1908_v54 = vmul.f32 1.442695, %v1882_v43  ;;  %v1910_v50 = vmul.f32 1.442695, %v1883_v46  ;;  %v1885_v30 = vsub.f32 %v3621_v31, %v3656_v21 }
 0x39b   : > { %2937 = vpow2.f32 %v1896_v63  ;;  %v1912_v0 = vmul.f32 1.442695, %v1884_v29  ;;  %v1886_v38 = vsub.f32 %v3643_v48, %v3656_v21  ;;  %v1887_v12 = vsub.f32 %v3651_v58, %v3656_v21 }
 0x39c   : > { %2939 = vpow2.f32 %v1898_v20  ;;  %v1914_v31 = vmul.f32 1.442695, %v1885_v30 }
 0x39d   : > { %2941 = vpow2.f32 %v1900_v39  ;;  %v1916_v61 = vmul.f32 1.442695, %v1886_v38  ;;  %v1918_v24 = vmul.f32 1.442695, %v1887_v12 }
 0x39e   : > { %2943 = vpow2.f32 %v1902_v3 }
 0x39f   : > { %v3677_v40 = vpop.eup %2927  ;;  %2945 = vpow2.f32 %v1904_v14 }
 0x3a0   : > { %2030 = vperm.xlu1 %2637, %v3677_v40   ;;  %2947 = vpow2.f32 %v1906_v28 }
 0x3a1   : > { %v2930_v22 = vpop.eup %2929  ;;  %2949 = vpow2.f32 %v1908_v54 }
 0x3a2   : > { %v2932_v44 = vpop.eup %2931  ;;  %v1922_v45 = vsel %vm1824_vm3, %v2930_v22, 0.0  ;;  %2951 = vpow2.f32 %v1910_v50 }
 0x3a3   : > { %v2934_v47 = vpop.eup %2933  ;;  %v1923_v49 = vsel %vm1824_vm3, %v2932_v44, 0.0  ;;  %v1962_v23 = vpack.c.bf16 %v2932_v44, %v2930_v22  ;;  %2953 = vpow2.f32 %v1912_v0 }
 0x3a4   : > { %v2936_v51 = vpop.eup %2935  ;;  %v1924_v52 = vadd.f32 %v1923_v49, %v1922_v45  ;;  %v1925_v55 = vsel %vm1824_vm3, %v2934_v47, 0.0  ;;  %2955 = vpow2.f32 %v1914_v31 }
 0x3a5   : > { %1970 = vxpose.xlu0.c.b16.start [1/8] (narrow) %v1962_v23, 16  ;;  %v2938_v56 = vpop.eup %2937  ;;  %v1927_v17 = vsel %vm1824_vm3, %v2936_v51, 0.0  ;;  %v1963_v59 = vpack.c.bf16 %v2936_v51, %v2934_v47  ;;  %2957 = vpow2.f32 %v1916_v61 }
 0x3a6   : > { %v1926_v57 = vadd.f32 %v1925_v55, %v1924_v52  ;;  %v2940_v60 = vpop.eup %2939  ;;  %v1929_v1 = vsel %vm1824_vm3, %v2938_v56, 0.0  ;;  %2959 = vpow2.f32 %v1918_v24  ;;  %v3106_v24 = vmov (!%p2433_p9), 0  }
 0x3a7   : > { %v2942_v11 = vpop.eup %2941  ;;  %v1931_v15 = vsel %vm1824_vm3, %v2940_v60, 0.0  ;;  %v1964_v16 = vpack.c.bf16 %v2940_v60, %v2938_v56  ;;  %v1920_v56 = vld [vmem:[#allocation3] sm:$0x1]  ;;  %v3105_v60 = vmov 1966171168  }
 0x3a8   : > { %v1928_v42 = vadd.f32 %v1927_v17, %v1926_v57  ;;  %v2944_v18 = vpop.eup %2943  ;;  %v1933_v48 = vsel %vm1824_vm3, %v2942_v11, 0.0  ;;  %v1921_v50 = vmul.f32 %v3677_v40, %v1920_v56 }
 0x3a9   : > { %1971 = vxpose.xlu0.c.b16.cont [2/8] (narrow) %v1963_v59, 16  ;;  %v2946_v53 = vpop.eup %2945  ;;  %v1935_v26 = vsel %vm1824_vm3, %v2944_v18, 0.0  ;;  %v1965_v58 = vpack.c.bf16 %v2944_v18, %v2942_v11 }
 0x3aa   : > { %v1930_v13 = vadd.f32 %v1929_v1, %v1928_v42  ;;  %v2948_v21 = vpop.eup %2947  ;;  %v1937_v32 = vsel %vm1824_vm3, %v2946_v53, 0.0  ;;  %v2042_v42 = vunpack.c.l.s4 %v3105_v60 }
 0x3ab   : > { %v2950_v33 = vpop.eup %2949  ;;  %v1939_v35 = vsel %vm1824_vm3, %v2948_v21, 0.0  ;;  %v1966_v36 = vpack.c.bf16 %v2948_v21, %v2946_v53  ;;  %v2097_v53 = vld [vmem:[%s3862_s7 + $0x88] sm:$0xff] (!%p2433_p9) }
 0x3ac   : > { %v1932_v19 = vadd.f32 %v1931_v15, %v1930_v13  ;;  %v2952_v37 = vpop.eup %2951  ;;  %v1941_v63 = vsel %vm1824_vm3, %v2950_v33, 0.0  ;;  %v2043_v0 = vunpack.c.0.s8 %v2042_v42  ;;  %v2027_v15 = vld [vmem:[#allocation4] sm:$0x3]  ;;  %v2094_v42 = vld [vmem:[%s3862_s7 + $0x70] sm:$0xff] (!%p2433_p9) }
 0x3ad   : > { %1972 = vxpose.xlu0.c.b16.cont [3/8] (narrow) %v1964_v16, 16  ;;  %v2954_v2 = vpop.eup %2953  ;;  %v1943_v9 = vsel %vm1824_vm3, %v2952_v37, 0.0  ;;  %v1967_v39 = vpack.c.bf16 %v2952_v37, %v2950_v33  ;;  %v2083_v33 = vld [vmem:[%s3862_s7 + $0x18] sm:$0xff] (!%p2433_p9) }
 0x3ae   : > { %v1934_v25 = vadd.f32 %v1933_v48, %v1932_v19  ;;  %v2956_v10 = vpop.eup %2955  ;;  %v1945_v41 = vsel %vm1824_vm3, %v2954_v2, 0.0  ;;  %v2046_v11 = vsub.s32 %v2043_v0, %v3419_v5  ;;  %v2096_v5 = vld [vmem:[%s3862_s7 + $0x80] sm:$0xff] (!%p2433_p9)  ;;  %v2095_v0 = vld [vmem:[%s3862_s7 + $0x78] sm:$0xff] (!%p2433_p9) }
 0x3af   : > { %v2958_v14 = vpop.eup %2957  ;;  %v1947_v22 = vsel %vm1824_vm3, %v2956_v10, 0.0  ;;  %v1968_v44 = vpack.c.bf16 %v2956_v10, %v2954_v2  ;;  %v2085_v2 = vld [vmem:[%s3862_s7 + $0x28] sm:$0xff] (!%p2433_p9) }
 0x3b0   : > { %v1936_v27 = vadd.f32 %v1935_v26, %v1934_v25  ;;  %v2960_v45 = vpop.eup %2959  ;;  %v1949_v46 = vsel %vm1824_vm3, %v2958_v14, 0.0  ;;  %v2475_v25 = vpack.c.bf16 (!%p2433_p9), %v2097_v53, %v2096_v5  ;;  %v2081_v26 = vld [vmem:[%s3862_s7 + $0x8] sm:$0xff] (!%p2433_p9) }
 0x3b1   : > { %1973 = vxpose.xlu0.c.b16.cont [4/8] (narrow) %v1965_v58, 16  ;;  %v1951_v49 = vsel %vm1824_vm3, %v2960_v45, 0.0  ;;  %v1969_v23 = vpack.c.bf16 %v2960_v45, %v2958_v14  ;;  %vm2059_vm3 = vcmp.lt.s32.totalorder %v469_v4, 256  ;;  %v2080_v4 = vld [vmem:[%s3862_s7] sm:$0xff] (!%p2433_p9)  ;;  %v2098_v58 = vld [vmem:[%s3862_s7 + $0x90] sm:$0xff] (!%p2433_p9) }
 0x3b2   : > { %v1938_v34 = vadd.f32 %v1937_v32, %v1936_v27  ;;  %v2477_v21 = vpack.c.bf16 (!%p2433_p9), %v2081_v26, %v2080_v4  ;;  %v2099_v27 = vld [vmem:[%s3862_s7 + $0x98] sm:$0xff] (!%p2433_p9)  ;;  %v2082_v32 = vld [vmem:[%s3862_s7 + $0x10] sm:$0xff] (!%p2433_p9)  ;;  %2476 = vmatprep.subr.bf16.mxu0 (!%p2433_p9), %v2475_v25  ;;  %v2104_v14 = vld [vmem:[%s3862_s7 + $0xc0] sm:$0xff] (!%p2433_p9) }
 0x3b3   : > { %v2481_v37 = vpack.c.bf16 (!%p2433_p9), %v2083_v33, %v2082_v32  ;;  %v2088_v45 = vld [vmem:[%s3862_s7 + $0x40] sm:$0xff] (!%p2433_p9) }
 0x3b4   : > { %v1940_v62 = vadd.f32 %v1939_v35, %v1938_v34  ;;  %v2479_v34 = vpack.c.bf16 (!%p2433_p9), %v2099_v27, %v2098_v58  ;;  %v2100_v35 = vld [vmem:[%s3862_s7 + $0xa0] sm:$0xff] (!%p2433_p9)  ;;  %2478 = vmatpush3.bf16.msra.mxu0 (!%p2433_p9), %v2477_v21 }
 0x3b5   : > { %1974 = vxpose.xlu0.c.b16.cont [5/8] (narrow) %v1966_v36, 16  ;;  %v2101_v36 = vld [vmem:[%s3862_s7 + $0xa8] sm:$0xff] (!%p2433_p9) }
 0x3b6   : > { %v1942_v20 = vadd.f32 %v1941_v63, %v1940_v62  ;;  %2480 = vmatprep.subr.bf16.mxu0 (!%p2433_p9), %v2479_v34  ;;  %v2483_v62 = vpack.c.bf16 (!%p2433_p9), %v2101_v36, %v2100_v35  ;;  %v2084_v63 = vld [vmem:[%s3862_s7 + $0x20] sm:$0xff] (!%p2433_p9) }
 0x3b8   : > { %v1944_v3 = vadd.f32 %v1943_v9, %v1942_v20  ;;  %v2102_v20 = vld [vmem:[%s3862_s7 + $0xb0] sm:$0xff] (!%p2433_p9)  ;;  %v2103_v9 = vld [vmem:[%s3862_s7 + $0xb8] sm:$0xff] (!%p2433_p9)  ;;  %2482 = vmatpush3.bf16.msra.mxu0 (!%p2433_p9), %v2481_v37 }
 0x3b9   : > { %1975 = vxpose.xlu0.c.b16.cont [6/8] (narrow) %v1967_v39, 16  ;;  %v2485_v39 = vpack.c.bf16 (!%p2433_p9), %v2085_v2, %v2084_v63  ;;  %2484 = vmatprep.subr.bf16.mxu0 (!%p2433_p9), %v2483_v62  ;;  %v2487_v10 = vpack.c.bf16 (!%p2433_p9), %v2103_v9, %v2102_v20 }
 0x3ba   : > { %v1946_v43 = vadd.f32 %v1945_v41, %v1944_v3  ;;  %v2086_v3 = vld [vmem:[%s3862_s7 + $0x30] sm:$0xff] (!%p2433_p9)  ;;  %v2087_v41 = vld [vmem:[%s3862_s7 + $0x38] sm:$0xff] (!%p2433_p9) }
 0x3bc   : > { %v1948_v28 = vadd.f32 %v1947_v22, %v1946_v43  ;;  %v2105_v43 = vld [vmem:[%s3862_s7 + $0xc8] sm:$0xff] (!%p2433_p9)  ;;  %2486 = vmatpush3.bf16.msra.mxu0 (!%p2433_p9), %v2485_v39  ;;  %v2489_v22 = vpack.c.bf16 (!%p2433_p9), %v2087_v41, %v2086_v3 }
 0x3bd   : > { %1976 = vxpose.xlu0.c.b16.cont [7/8] (narrow) %v1968_v44, 16  ;;  %2488 = vmatprep.subr.bf16.mxu0 (!%p2433_p9), %v2487_v10  ;;  %v2491_v44 = vpack.c.bf16 (!%p2433_p9), %v2105_v43, %v2104_v14 }
 0x3be   : > { %v1950_v47 = vadd.f32 %v1949_v46, %v1948_v28  ;;  %v2089_v28 = vld [vmem:[%s3862_s7 + $0x48] sm:$0xff] (!%p2433_p9)  ;;  %v2106_v46 = vld [vmem:[%s3862_s7 + $0xd0] sm:$0xff] (!%p2433_p9) }
 0x3c0   : > { %v1952_v51 = vadd.f32 %v1951_v49, %v1950_v47  ;;  %v2107_v47 = vld [vmem:[%s3862_s7 + $0xd8] sm:$0xff] (!%p2433_p9)  ;;  %2490 = vmatpush3.bf16.msra.mxu0 (!%p2433_p9), %v2489_v22  ;;  %v2493_v49 = vpack.c.bf16 (!%p2433_p9), %v2089_v28, %v2088_v45 }
 0x3c1   : > { %1977 = vxpose.xlu0.c.b16.end [8/8] (narrow) %v1969_v23, 16  ;;  %2492 = vmatprep.subr.bf16.mxu0 (!%p2433_p9), %v2491_v44  ;;  %v2495_v23 = vpack.c.bf16 (!%p2433_p9), %v2107_v47, %v2106_v46 }
 0x3c2   : > { %v1953_v52 = vrot.slane %v1952_v51, 4 }
 0x3c4   : > { %v1954_v54 = vadd.f32 %v1953_v52, %v1952_v51  ;;  %v2090_v51 = vld [vmem:[%s3862_s7 + $0x50] sm:$0xff] (!%p2433_p9)  ;;  %v2091_v52 = vld [vmem:[%s3862_s7 + $0x58] sm:$0xff] (!%p2433_p9)  ;;  %2494 = vmatpush3.bf16.msra.mxu0 (!%p2433_p9), %v2493_v49 }
 0x3c5   : > { %2496 = vmatprep.subr.bf16.mxu0 (!%p2433_p9), %v2495_v23 }
 0x3c6   : > { %v1955_v29 = vrot.slane %v1954_v54, 2 }
 0x3c8   : > { %v1956_v55 = vadd.f32 %v1955_v29, %v1954_v54  ;;  %v2108_v54 = vld [vmem:[%s3862_s7 + $0xe0] sm:$0xff] (!%p2433_p9)  ;;  %v2109_v29 = vld [vmem:[%s3862_s7 + $0xe8] sm:$0xff] (!%p2433_p9) }
 0x3c9   : > { %v2499_v56 = vpack.c.bf16 (!%p2433_p9), %v2109_v29, %v2108_v54 }
 0x3ca   : > { %v1957_v57 = vrot.slane %v1956_v55, 1  ;;  %2638 = vset.pattern.permute.xlu0 %v3104_v7 }
 0x3cb   : > { %2961 = vset.pattern.permute.xlu0 (!%p2433_p9), %v3106_v24 }
 0x3cc   : > { %v1958_v30 = vadd.f32 %v1957_v57, %v1956_v55  ;;  %v2497_v55 = vpack.c.bf16 (!%p2433_p9), %v2091_v52, %v2090_v51  ;;  %v2092_v57 = vld [vmem:[%s3862_s7 + $0x60] sm:$0xff] (!%p2433_p9) }
 0x3ce   : > { %v1959_v17 = vadd.f32 %v1958_v30, %v1921_v50  ;;  %v2093_v50 = vld [vmem:[%s3862_s7 + $0x68] sm:$0xff] (!%p2433_p9)  ;;  %v2110_v30 = vld [vmem:[%s3862_s7 + $0xf0] sm:$0xff] (!%p2433_p9)  ;;  %2498 = vmatpush3.bf16.msra.mxu0 (!%p2433_p9), %v2497_v55 }
 0x3cf   : > { %2500 = vmatprep.subr.bf16.mxu0 (!%p2433_p9), %v2499_v56 }
 0x3d0   : > { %1961 = vst.msk [vmem:[#allocation3] sm:$0x1] %vm1960_vm4, %v1959_v17  ;;  %v2111_v17 = vld [vmem:[%s3862_s7 + $0xf8] sm:$0xff] (!%p2433_p9) }
 0x3d1   : > { %v2503_v60 = vpack.c.bf16 (!%p2433_p9), %v2111_v17, %v2110_v30 }
 0x3d7   : > { %v2068_v48 = vld [vmem:[#allocation3] sm:$0x1] (!%p2433_p9) }
 0x3d8   : > { %2071 = vperm.xlu0 (!%p2433_p9), %2961, %v2068_v48  }
 0x40b   : > { %v1978_v59 = vpop.trf.xlu0 }
 0x40c   : > { %2019 = vmatmul.mubr.bf16.vlgmr.msra.gmra.mrb[32].mxu1 %v1978_v59  ;;  %v2501_v59 = vpack.c.bf16 (!%p2433_p9), %v2093_v50, %v2092_v57 }
 0x40e   : > { %2502 = vmatpush3.bf16.msra.mxu0 (!%p2433_p9), %v2501_v59 }
 0x40f   : > { %2504 = vmatprep.subr.bf16.mxu0 (!%p2433_p9), %v2503_v60 }
 0x41f   : > { %v2031_v38 = vpop.permute.xlu1 %2030 }
 0x420   : > { %v2036_v13 = vrot.slane %v2031_v38, %v3422_v6  ;;  %v2505_v38 = vpack.c.bf16 (!%p2433_p9), %v2095_v0, %v2094_v42 }
 0x422   : > { %v2037_v18 = vmul.f32 %v2036_v13, %v2027_v15  ;;  %2506 = vmatpush3.bf16.msra.mxu0 (!%p2433_p9), %v2505_v38 }
 0x4df   : > { %v2020_v1 = vpop.f32.mrb[32].mxu1 }
 0x4e0   : > { %v2022_v12 = vpop.f32.mrb[33].mxu1 }
 0x4e1   : > { %v2040_v31 = vcombine.low %v2020_v1, %v2022_v12  ;;  %v2024_v7 = vpop.f32.mrb[34].mxu1  ;;  %v2072_v1 = vpop.permute.xlu0 (!%p2433_p9), %2071 }
 0x4e2   : > { %v2025_v40 = vpop.f32.mrb[35].mxu1 }
 0x4e3   : > { %v2047_v16 = vrot.slane %v2040_v31, %v2046_v11  ;;  %2066 = sbr.rel (%p2433_p9) target bundleno = 1803 (0x70b), region = 72 }
 0x4e5   : > { %v2054_v19 = vrot.slane %v2047_v16, %v2046_v11  ;;  %v2077_v11 = vrot.slane (!%p2433_p9), %v2072_v1, %v3422_v6 }
 0x4e7   : > { %v2056_v61 = vadd.f32 %v2054_v19, %v2037_v18  ;;  %2962 = vrcp.f32 (!%p2433_p9), %v2077_v11  ;;  %v2112_v18 = vld [vmem:[%s3863_s8] sm:$0x1] (!%p2433_p9) }
 0x4e9   : > { %2061 = vst.msk [vmem:[#allocation4] sm:$0x3] %vm2059_vm3, %v2056_v61 }
 0x4f0   : > { %v2067_v12 = vld [vmem:[#allocation4] sm:$0x3] }
 0x4f1   : > { %v2963_v13 = vpop.eup %2962 }
 0x4f2   : > { %v2079_v31 = vmul.f32 %v2963_v13, %v2067_v12 }
 0x4f4   : > { %v2121_v7 = vrot.slane %v2079_v31, %v3428_v8  ;;  %v2117_v15 = vrot.slane %v2079_v31, %v3422_v6 }
 0x4f6   : > { %2188 = vmatprep.mubr.f32.mxu0 %v2121_v7 }
 0x4f7   : > { %2189 = vmatmul.mubr.f32.vlgmr.msra.gmra.mrb[0].mxu0 %v2117_v15 }
 0x5ca   : > { %v2472_v40 = vpop.f32.mrb[0].mxu0 }
 0x5cb   : > { %v2473_v16 = vpop.f32.mrb[1].mxu0 }
 0x5cc   : > { %v2474_v19 = vadd.f32 %v2473_v16, %v2472_v40 }
 0x5ce   : > { %v2191_v61 = vadd.f32 %v2474_v19, %v2112_v18 }
 0x5d0   : > { %v2195_v48 = vsel %vm2194_vm5, %v2191_v61, -inf }
 0x5d1   : > { %2196 = vmax.xlane.f32.xlu0 %v2195_v48 }
 0x65e   : > { %v2197_v5 = vpop.xlane.xlu0 %2196 }
 0x65f   : > { %v2198_v53 = vsub.f32 %v2191_v61, %v2197_v5 }
 0x661   : > { %v2199_v24 = vmul.f32 1.442695, %v2198_v53 }
 0x663   : > { %2964 = vpow2.f32 %v2199_v24 }
 0x66d   : > { %v2965_v8 = vpop.eup %2964 }
 0x66e   : > { %v2201_v25 = vsel %vm2194_vm5, %v2965_v8, 0.0 }
 0x66f   : > { %2202 = vadd.xlane.f32.xlu1 %v2201_v25 }
 0x6fc   : > { %v2203_v6 = vpop.xlane.xlu1 %2202 }
 0x6fd   : > { %2966 = vrcp.f32 %v2203_v6 }
 0x707   : > { %v2967_v4 = vpop.eup %2966 }
 0x708   : > { %v2205_v26 = vmul.f32 %v2967_v4, %v2965_v8 }
 0x70a   : > { %2206 = vst.msk [vmem:[#allocation11] sm:$0x1] %vm2194_vm5, %v2205_v26 }
 0x70b PF: > { %p2592_p10 = scmp.eq.s32.totalorder %s3180_s6, 2  ;;  %s3107_s21 = smov [#allocation11]  }
 0x70c   : > { %s2214_s14 = sshll.u32 %s3107_s21, 4  ;;  %s2215_s14 = int_to_ptr.vmem [resolvable:$true] %s2214_s14 }
 0x70d   : > { %s3026_s26 = scalar_lea.vmem %s2215_s14, 16  ;;  %s3032_s25 = scalar_lea.vmem %s2215_s14, 32 }
 0x70e   : > { %p3027_p1 = scmp.ne.s32.totalorder %s2215_s14, %s3026_s26  ;;  %p3033_p8 = scmp.lt.s32.totalorder %s2215_s14, %s2215_s14 }
 0x70f   : > { %p3034_p12 = scmp.lt.s32.totalorder %s3032_s25, %s3026_s26 }
 0x710   : > { %p3028_p4 = pnand %p3027_p1, %p2592_p10 }
 0x711   : > { %p3035_p0 = por %p3034_p12, %p3033_p8 }
 0x712   : > { %p3029_p5 = pneg %p3028_p4 }
 0x714   : > { %p3036_p2 = pnand %p3035_p0, %p3029_p5 }
 0x716   : > { %3039 = shalt.err (!%p3036_p2)
}
 0x717   : > { %s3040_s29 = scalar_lea.hbm %s3864_s9, 16 }
 0x718   : > { %p3041_p11 = scmp.ne.s32.totalorder %s3864_s9, %s3040_s29  ;;  %p3046_p6 = scmp.lt.u32.totalorder %s3040_s29, %s3864_s9 }
 0x71a   : > { %p3042_p13 = pnand %p3041_p11, %p2592_p10 }
 0x71c   : > { %p3043_p3 = pneg %p3042_p13 }
 0x71e   : > { %p3048_p7 = pnand %p3046_p6, %p3043_p3 }
 0x720   : > { %3051 = shalt.err (!%p3048_p7)
}
 0x721   : > { %2578 = dma.vmem_to_hbm [thread:$0]  (%p2592_p10), %s2215_s14, 16, %s3864_s9, [#allocation8]  }
 0x722   : > { %3077 = dma.done.wait (%p2592_p10), [#allocation8], 16  }
 0x723   : > { %3079 = vsyncadd (%p2592_p10), [#allocation8], 4294967280 }
 0x724 PF: > { %p23_p9 = scmp.ge.s32.totalorder %s3206_s20, 5   ;;  %s3877_s11 = smov %s3086_s12 }
 0x725   : > { %s3878_s12 = smov %s3090_s13  ;;  %s3879_s13 = smov %s3232_s24 }
 0x726   : > { %s3880_s14 = smov %s3206_s20  ;;  %25 = sbr.rel (!%p23_p9) target bundleno = 8 (0x8), region = 105 }
 0x72d   :  { %2227 = vsyncpa [#allocation7], 1 }
 0x72e   :  { %2229 = vsyncpa [#allocation7 + $0x1], 1 }
 0x72f   :  { %2230 = vsyncpa [#allocation10], 1 }
 0x730   :  { %2231 = vsyncpa [#allocation8], 1 }
 0x731   :  { %2233 = vsyncpa [#allocation8 + $0x1], 1 }

</bundles_post_ra>
